<compile_context>
chip_gen: v7x
topology: tpu7x:2x2x1
jax: 0.10.0
libtpu: 0.0.40
codegen_flags: <defaults>
</compile_context>

<pallas_src>
import math
from functools import partial

import jax
import jax.numpy as jnp
from jax.experimental import pallas as pl
from jax.experimental.pallas import tpu as pltpu


# ----------------------------------------------------------------------------
# Global tuning knobs / capability probes
# ----------------------------------------------------------------------------

_MAX_ROW_TILE = 512     # rowwise kernels (mem-bound: bigger tile -> closer to roofline)
_MAX_Q_TILE = 256       # attention query tile


def _compute_vmem_limit():
    # ~75% of physical VMEM: ~96 MiB on v5e/v6e (128 MiB), ~48 MiB on v7x (64 MiB).
    try:
        cap = int(pltpu.get_tpu_info().vmem_capacity_bytes)
        return max(32 << 20, (cap * 3) // 4)
    except Exception:
        return 48 << 20


_VMEM_LIMIT = _compute_vmem_limit()


def _probe_single_buffer_support():
    """Check whether pipeline_mode=pl.Buffered(1) lowers on this jax build."""
    try:
        def _copy(x_ref, o_ref):
            o_ref[...] = x_ref[...]
        f = pl.pallas_call(
            _copy,
            out_shape=jax.ShapeDtypeStruct((8, 128), jnp.float32),
            grid=(1,),
            in_specs=[pl.BlockSpec((8, 128), lambda i: (0, 0),
                                   pipeline_mode=pl.Buffered(1))],
            out_specs=pl.BlockSpec((8, 128), lambda i: (i, 0)),
        )
        jax.block_until_ready(f(jnp.zeros((8, 128), jnp.float32)))
        return True
    except Exception:
        return False


_SINGLE_BUFFER_WEIGHTS = _probe_single_buffer_support()


def _const_spec(shape):
    """BlockSpec for a grid-invariant (resident) operand; single-buffered if possible."""
    idx = lambda *_: (0,) * len(shape)
    if _SINGLE_BUFFER_WEIGHTS:
        return pl.BlockSpec(shape, idx, pipeline_mode=pl.Buffered(1))
    return pl.BlockSpec(shape, idx)


# ----------------------------------------------------------------------------
# Row-tiled pallas_call helper (grid over rows, weights resident, "parallel")
# ----------------------------------------------------------------------------

def _call_rowwise(kernel_fn, row_inputs, const_inputs, out_dims):
    """Run `kernel_fn` on row-tiles of 2-D row_inputs; const_inputs (2-D) are
    passed whole with a constant index_map (kept resident in VMEM).  No HBM
    padding / slicing: the ragged last block is handled by Pallas."""
    rows = row_inputs[0].shape[0]
    tile = rows if rows <= _MAX_ROW_TILE else _MAX_ROW_TILE
    grid = (pl.cdiv(rows, tile),)

    operands, in_specs = [], []
    for a in row_inputs:
        a = a.astype(jnp.float32)
        operands.append(a)
        in_specs.append(pl.BlockSpec((tile, a.shape[1]), lambda i: (i, 0)))
    for c in const_inputs:
        operands.append(c)
        in_specs.append(_const_spec(c.shape))

    multi = not isinstance(out_dims, int)
    dims = tuple(out_dims) if multi else (out_dims,)
    out_shape = tuple(jax.ShapeDtypeStruct((rows, d), jnp.float32) for d in dims)
    out_specs = tuple(pl.BlockSpec((tile, d), lambda i: (i, 0)) for d in dims)
    if not multi:
        out_shape, out_specs = out_shape[0], out_specs[0]

    return pl.pallas_call(
        kernel_fn,
        out_shape=out_shape,
        grid=grid,
        in_specs=in_specs,
        out_specs=out_specs,
        compiler_params=pltpu.CompilerParams(
            dimension_semantics=("parallel",),
            vmem_limit_bytes=_VMEM_LIMIT),
    )(*operands)


# ----------------------------------------------------------------------------
# Fused kernels
# ----------------------------------------------------------------------------

def _ln(x, eps):
    mu = jnp.mean(x, axis=-1, keepdims=True)
    xc = x - mu
    var = jnp.mean(xc * xc, axis=-1, keepdims=True)
    return xc * jax.lax.rsqrt(var + eps)


def _layernorm_kernel(x_ref, g_ref, b_ref, o_ref, *, eps):
    o_ref[...] = _ln(x_ref[...], eps) * g_ref[...] + b_ref[...]


def _ffn_kernel(x_ref, g_ref, bn_ref, w1_ref, b1_ref, w2_ref, b2_ref, o_ref, *, eps):
    # Pre-LN FFN: x + fc2(relu(fc1(LN(x)))); matmuls in bf16, accum f32.
    x = x_ref[...]
    y = _ln(x, eps) * g_ref[...] + bn_ref[...]
    hid = jnp.maximum(
        jnp.dot(y.astype(w1_ref.dtype), w1_ref[...],
                preferred_element_type=jnp.float32) + b1_ref[...], 0.0)
    o_ref[...] = x + jnp.dot(hid.astype(w2_ref.dtype), w2_ref[...],
                             preferred_element_type=jnp.float32) + b2_ref[...]


def _gvp_scalar_kernel(s_ref, rbf_ref, ws_ref, bs_ref, g_ref, bn_ref,
                       wc_ref, bc_ref, o_ref, *, eps):
    s = jnp.dot(s_ref[...].astype(ws_ref.dtype), ws_ref[...],
                preferred_element_type=jnp.float32) + bs_ref[...]
    s = _ln(s, eps) * g_ref[...] + bn_ref[...]
    o_ref[...] = s + jnp.dot(rbf_ref[...].astype(wc_ref.dtype), wc_ref[...],
                             preferred_element_type=jnp.float32) + bc_ref[...]


def _embed_fusion_kernel(tok_ref, pos_ref, dih_ref, feat_ref, pad_ref,
                         wd_ref, bd_ref, dg_ref, db_ref, wc_ref, bc_ref,
                         embed_ref, x_ref, *, eps):
    # dihedral features: linear(6 -> D) + struct2seq "Normalize" (unbiased var, sigma+eps)
    d = jnp.dot(dih_ref[...].astype(wd_ref.dtype), wd_ref[...],
                preferred_element_type=jnp.float32) + bd_ref[...]
    mu = jnp.mean(d, axis=-1, keepdims=True)
    dc = d - mu
    var = jnp.sum(dc * dc, axis=-1, keepdims=True) / (d.shape[-1] - 1)
    d = dc / (jnp.sqrt(var + eps) + eps) * dg_ref[...] + db_ref[...]
    # confidence(16) + gvp_input(15) + gvp_output(Hs+3Hv) projections as one stacked matmul
    other = jnp.dot(feat_ref[...].astype(wc_ref.dtype), wc_ref[...],
                    preferred_element_type=jnp.float32) + bc_ref[...]
    embed = tok_ref[...] + d + other
    embed_ref[...] = embed
    x_ref[...] = (embed + pos_ref[...]) * (1.0 - pad_ref[...])


def _fused_attn_kernel(x_ref, m_ref, g_ref, bn_ref, wq_ref, bq_ref,
                       wkv_ref, bkv_ref, wo_ref, bo_ref, o_ref,
                       k_sc, v_sc, att_sc, *, H, tq, eps):
    """LN1 + QKV projection + multi-head attention + out-projection + residual.

    Grid = (B, T // tq).  x_ref holds the full (1, T, D) sequence for this
    batch element (index constant along the query axis).  K/V for the whole
    sequence are computed once at the first query tile and kept in bf16 VMEM
    scratch (persists across grid steps).  Softmax scale is pre-folded into
    wq / bq at init.  Scores / softmax stay in f32 (mask bias -1e9 in f32)."""
    qi = pl.program_id(1)
    T = x_ref.shape[1]
    D = x_ref.shape[2]
    Dh = D // H

    @pl.when(qi == 0)
    def _():
        xs = x_ref[0]                                        # (T, D) f32
        y = _ln(xs, eps) * g_ref[...] + bn_ref[...]
        kv = jnp.dot(y.astype(wkv_ref.dtype), wkv_ref[...],
                     preferred_element_type=jnp.float32) + bkv_ref[...]
        k_sc[...] = kv[:, :D].astype(k_sc.dtype)
        v_sc[...] = kv[:, D:].astype(v_sc.dtype)

    q_start = pl.multiple_of(qi * tq, tq)
    xq = x_ref[0, pl.ds(q_start, tq), :]                     # (tq, D) residual (f32)
    yq = _ln(xq, eps) * g_ref[...] + bn_ref[...]
    q = jnp.dot(yq.astype(wq_ref.dtype), wq_ref[...],
                preferred_element_type=jnp.float32) + bq_ref[...]   # scale folded in
    mask_bias = m_ref[0] * (-1e9)                            # (1, T) f32, 1.0 = pad key

    for h in range(H):
        qh = q[:, h * Dh:(h + 1) * Dh].astype(k_sc.dtype)
        kh = k_sc[:, h * Dh:(h + 1) * Dh]
        s = jax.lax.dot_general(qh, kh, (((1,), (1,)), ((), ())),
                                preferred_element_type=jnp.float32)   # (tq, T) f32
        s = s + mask_bias
        s = s - jnp.max(s, axis=-1, keepdims=True)
        p = jnp.exp(s)
        # approx reciprocal on the EUP (~1e-4 rel error) — fine for inference.
        p = p * pl.reciprocal(jnp.sum(p, axis=-1, keepdims=True), approx=True)
        oh = jnp.dot(p.astype(v_sc.dtype), v_sc[:, h * Dh:(h + 1) * Dh],
                     preferred_element_type=jnp.float32)
        att_sc[:, h * Dh:(h + 1) * Dh] = oh.astype(att_sc.dtype)

    o_ref[0] = (jnp.dot(att_sc[...], wo_ref[...], preferred_element_type=jnp.float32)
                + bo_ref[...] + xq)


def _q_tile(T, max_tile=_MAX_Q_TILE):
    if T <= max_tile:
        return T
    for t in range(max_tile, 7, -8):
        if T % t == 0:
            return t
    return T


def pallas_attention_layer(x, mask_b1t, lp, H, eps=1e-5):
    """x: (B, T, D) f32; mask_b1t: (B, 1, T) f32 (1 = pad).
    Returns x + out_proj(MHA(LN1(x)))."""
    B, T, D = x.shape
    tq = _q_tile(T)
    grid = (B, T // tq)
    return pl.pallas_call(
        partial(_fused_attn_kernel, H=H, tq=tq, eps=eps),
        out_shape=jax.ShapeDtypeStruct((B, T, D), jnp.float32),
        grid=grid,
        in_specs=[
            pl.BlockSpec((1, T, D), lambda b, q: (b, 0, 0)),   # full sequence, per batch
            pl.BlockSpec((1, 1, T), lambda b, q: (b, 0, 0)),
            _const_spec(lp["ln1_g"].shape),
            _const_spec(lp["ln1_b"].shape),
            _const_spec(lp["wq"].shape),
            _const_spec(lp["bq"].shape),
            _const_spec(lp["wkv"].shape),
            _const_spec(lp["bkv"].shape),
            _const_spec(lp["wo"].shape),
            _const_spec(lp["bo"].shape),
        ],
        out_specs=pl.BlockSpec((1, tq, D), lambda b, q: (b, q, 0)),
        scratch_shapes=[
            pltpu.VMEM((T, D), jnp.bfloat16),   # K (whole sequence)
            pltpu.VMEM((T, D), jnp.bfloat16),   # V (whole sequence)
            pltpu.VMEM((tq, D), jnp.bfloat16),  # per-tile head-concat attention output
        ],
        compiler_params=pltpu.CompilerParams(
            dimension_semantics=("parallel", "arbitrary"),
            vmem_limit_bytes=_VMEM_LIMIT),
    )(x, mask_b1t, lp["ln1_g"], lp["ln1_b"], lp["wq"], lp["bq"],
      lp["wkv"], lp["bkv"], lp["wo"], lp["bo"])


# ----------------------------------------------------------------------------
# Geometric featurization (plain-JAX glue, mirrors esm.inverse_folding features)
# ----------------------------------------------------------------------------

def norm_vec(x, axis=-1):
    n = jnp.sqrt(jnp.sum(x * x, axis=axis, keepdims=True))
    r = x / n
    return jnp.where(jnp.isfinite(r), r, 0.0)


def dihedrals(X, eps=1e-7):
    # X: (B, N, 3, 3) -> (B, N, 6)
    B = X.shape[0]
    Xf = X[:, :, :3].reshape(B, -1, 3)
    dX = Xf[:, 1:] - Xf[:, :-1]
    U = norm_vec(dX)
    u_2, u_1, u_0 = U[:, :-2], U[:, 1:-1], U[:, 2:]
    n_2 = norm_vec(jnp.cross(u_2, u_1))
    n_1 = norm_vec(jnp.cross(u_1, u_0))
    cosD = jnp.sum(n_2 * n_1, axis=-1)
    cosD = jnp.clip(cosD, -1 + eps, 1 - eps)
    D = jnp.sign(jnp.sum(u_2 * n_1, axis=-1)) * jnp.arccos(cosD)
    D = jnp.pad(D, ((0, 0), (1, 2)))
    D = D.reshape(B, -1, 3)
    return jnp.concatenate([jnp.cos(D), jnp.sin(D)], axis=-1)


def orientations(X_ca):
    fwd = norm_vec(X_ca[:, 1:] - X_ca[:, :-1])
    bwd = norm_vec(X_ca[:, :-1] - X_ca[:, 1:])
    fwd = jnp.pad(fwd, ((0, 0), (0, 1), (0, 0)))
    bwd = jnp.pad(bwd, ((0, 0), (1, 0), (0, 0)))
    return jnp.concatenate([fwd[:, :, None, :], bwd[:, :, None, :]], axis=-2)


def sidechains(X):
    n, origin, c = X[:, :, 0], X[:, :, 1], X[:, :, 2]
    c = norm_vec(c - origin)
    n = norm_vec(n - origin)
    bisector = norm_vec(c + n)
    perp = norm_vec(jnp.cross(c, n))
    return -bisector * math.sqrt(1.0 / 3) - perp * math.sqrt(2.0 / 3)


def get_node_features(coords, coord_mask, with_coord_mask):
    s = dihedrals(coords)                                     # (B, N, 6)
    if with_coord_mask:
        s = jnp.concatenate([s, coord_mask[..., None].astype(jnp.float32)], axis=-1)
    X_ca = coords[:, :, 1]
    v = jnp.concatenate([orientations(X_ca), sidechains(coords)[:, :, None, :]], axis=-2)
    return s, v                                               # (B,N,6|7), (B,N,3,3)


def get_rotation_frames(coords):
    v1 = coords[:, :, 2] - coords[:, :, 1]
    v2 = coords[:, :, 0] - coords[:, :, 1]
    e1 = norm_vec(v1)
    u2 = v2 - e1 * jnp.sum(e1 * v2, axis=-1, keepdims=True)
    e2 = norm_vec(u2)
    e3 = jnp.cross(e1, e2)
    return jnp.stack([e1, e2, e3], axis=-2)                   # (B, N, 3, 3)


def rotate_by_RT(v, R):
    # rotate(v, R.transpose(-2,-1)) of the torch code  ==  v @ R^T
    return jnp.einsum("bnvj,bnkj->bnvk", v, R)


def rbf16(values, v_min=0.0, v_max=1.0, n_bins=16):
    centers = jnp.linspace(v_min, v_max, n_bins)
    std = (v_max - v_min) / n_bins
    z = (values[..., None] - centers) / std
    return jnp.exp(-z * z)


def sinusoidal_positional_embedding(tokens, embed_dim, padding_idx):
    B, N = tokens.shape
    num_embeddings = padding_idx + 1 + N
    half_dim = embed_dim // 2
    emb = math.log(10000.0) / (half_dim - 1)
    emb = jnp.exp(jnp.arange(half_dim, dtype=jnp.float32) * -emb)
    emb = jnp.arange(num_embeddings, dtype=jnp.float32)[:, None] * emb[None, :]
    emb = jnp.concatenate([jnp.sin(emb), jnp.cos(emb)], axis=1)
    if embed_dim % 2 == 1:
        emb = jnp.concatenate([emb, jnp.zeros((num_embeddings, 1))], axis=1)
    emb = emb.at[padding_idx].set(0.0)
    mask = (tokens != padding_idx).astype(jnp.int32)
    positions = jnp.cumsum(mask, axis=1) * mask + padding_idx
    return emb[positions]


# ----------------------------------------------------------------------------
# GVP encoder (node branch of GVPGraphEmbedding)
# ----------------------------------------------------------------------------

def gvp_encoder_nodes(coords, coord_mask, conf_rbf, p, Hs, Hv):
    s_feat, v_feat = get_node_features(coords, coord_mask, with_coord_mask=True)
    B, N = s_feat.shape[:2]
    h = max(3, Hv)

    # Depth-3 / depth-h vector-channel mixes: plain einsums (VPU), K=3 can't feed the MXU.
    vh = jnp.einsum("bncx,ck->bnxk", v_feat, p["gvp_wh"])          # (B, N, 3, h)
    vn = jnp.sqrt(jnp.maximum(jnp.sum(vh * vh, axis=-2), 1e-8))    # (B, N, h)
    v_h = jnp.einsum("bnxk,kv->bnvx", vh, p["gvp_wv"])             # (B, N, Hv, 3)

    # Fused scalar path: linear(7+h -> Hs) + LayerNorm + confidence embedding add.
    s_cat = jnp.concatenate([s_feat, vn], axis=-1).reshape(B * N, 7 + h)
    s_out = _call_rowwise(
        partial(_gvp_scalar_kernel, eps=1e-5),
        [s_cat, conf_rbf.reshape(B * N, 16)],
        [p["gvp_ws"], p["gvp_bs"], p["gvp_ln_g"], p["gvp_ln_b"],
         p["gvp_conf_w"], p["gvp_conf_b"]],
        Hs).reshape(B, N, Hs)

    # GVP vector LayerNorm (mean-squared-norm normalization) — tiny elementwise, plain JAX.
    vn2 = jnp.maximum(jnp.sum(v_h * v_h, axis=-1, keepdims=True), 1e-8)
    nonzero = (vn2 > 2e-4).astype(jnp.float32)
    denom = jnp.sqrt(jnp.sum(vn2 * nonzero, axis=-2, keepdims=True)
                     / (1e-4 + jnp.sum(nonzero, axis=-2, keepdims=True)) + 1e-4)
    v_h = nonzero * v_h / denom
    return s_out, v_h


# ----------------------------------------------------------------------------
# Transformer encoder layer (pre-LN, fairseq-style) — 2 fused pallas_calls
# ----------------------------------------------------------------------------

def transformer_encoder_layer(x, mask_b1t, lp, H):
    B, T, D = x.shape
    # 1. fused LN1 + QKV + multi-head attention + out-projection + residual
    x = pallas_attention_layer(x, mask_b1t, lp, H)
    # 2. fused LN2 + fc1 + relu + fc2 + residual (the (rows, ffn) intermediate stays in VMEM)
    x = _call_rowwise(
        partial(_ffn_kernel, eps=1e-5),
        [x.reshape(B * T, D)],
        [lp["ln2_g"], lp["ln2_b"], lp["fc1_w"], lp["fc1_b"], lp["fc2_w"], lp["fc2_b"]],
        D)
    return x.reshape(B, T, D)


# ----------------------------------------------------------------------------
# GVPTransformerEncoder forward
# ----------------------------------------------------------------------------

def gvp_transformer_encoder_forward(params, coords, padding_mask, confidence, cfg):
    B, N = padding_mask.shape
    D = cfg["embed_dim"]
    Hs, Hv = cfg["gvp_hs"], cfg["gvp_hv"]
    rows = B * N

    coord_mask = jnp.all(jnp.all(jnp.isfinite(coords), axis=-1), axis=-1)
    coords = jnp.where(jnp.isfinite(coords), coords, 0.0)
    mask_tokens = jnp.where(padding_mask, cfg["padding_idx"], cfg["mask_idx"]).astype(jnp.int32)

    # --- forward_embedding components ---
    tok = params["embed_tokens"][mask_tokens] * math.sqrt(D)                     # (B,N,D)
    pos = sinusoidal_positional_embedding(mask_tokens, D, cfg["padding_idx"])    # (B,N,D)
    dih_raw = dihedrals(coords)                                                  # (B,N,6)
    conf_rbf = rbf16(confidence)                                                 # (B,N,16)

    gvp_s, gvp_v = gvp_encoder_nodes(coords, coord_mask, conf_rbf, params, Hs, Hv)
    R = get_rotation_frames(coords)
    gvp_feats = jnp.concatenate(
        [gvp_s, rotate_by_RT(gvp_v, R).reshape(B, N, 3 * Hv)], axis=-1)          # (B,N,Hs+3Hv)

    s_in, v_in = get_node_features(coords, coord_mask, with_coord_mask=False)
    in_feats = jnp.concatenate([s_in, rotate_by_RT(v_in, R).reshape(B, N, 9)], axis=-1)  # (B,N,15)

    # Stack the three tiny-K projections' features: [conf(16) | gvp_in(15) | gvp_out(Hs+3Hv)]
    feats_cat = jnp.concatenate([conf_rbf, in_feats, gvp_feats], axis=-1)
    pad_f = padding_mask.astype(jnp.float32)

    embed_flat, x_flat = _call_rowwise(
        partial(_embed_fusion_kernel, eps=1e-6),
        [tok.reshape(rows, D), pos.reshape(rows, D), dih_raw.reshape(rows, 6),
         feats_cat.reshape(rows, feats_cat.shape[-1]), pad_f.reshape(rows, 1)],
        [params["dih_w"], params["dih_b"], params["dih_norm_g"], params["dih_norm_b"],
         params["emb_cat_w"], params["emb_cat_b"]],
        (D, D))
    embed = embed_flat.reshape(B, N, D)
    x = x_flat.reshape(B, N, D)          # transformer stack runs in (B, T, D) layout

    mask_b1t = pad_f.reshape(B, 1, N)
    for lp in params["layers"]:
        x = transformer_encoder_layer(x, mask_b1t, lp, cfg["heads"])

    x = _call_rowwise(
        partial(_layernorm_kernel, eps=1e-5),
        [x.reshape(rows, D)],
        [params["final_ln_g"], params["final_ln_b"]],
        D).reshape(B, N, D)
    x = jnp.transpose(x, (1, 0, 2))      # single relayout to fairseq (T, B, D)

    return {
        "encoder_out": [x],
        "encoder_padding_mask": [padding_mask],
        "encoder_embedding": [embed],
        "encoder_states": [],
    }


# ----------------------------------------------------------------------------
# Deterministic parameter initialization (weights pre-fused, bf16, pre-scaled)
# ----------------------------------------------------------------------------

def init_params(key, cfg):
    D, Hs, Hv = cfg["embed_dim"], cfg["gvp_hs"], cfg["gvp_hv"]
    h = max(3, Hv)
    F = cfg["ffn"]
    H = cfg["heads"]
    keys = iter(jax.random.split(key, 128))

    def lin(fan_in, fan_out, bias=True):
        k1, k2 = jax.random.split(next(keys))
        w = jax.random.normal(k1, (fan_in, fan_out), jnp.float32) / math.sqrt(fan_in)
        b = (jax.random.normal(k2, (fan_out,), jnp.float32) * 0.02) if bias \
            else jnp.zeros((fan_out,), jnp.float32)
        return w, b

    bf16 = lambda w: w.astype(jnp.bfloat16)

    p = {}
    emb = jax.random.normal(next(keys), (cfg["vocab"], D), jnp.float32) * 0.02
    p["embed_tokens"] = emb.at[cfg["padding_idx"]].set(0.0)

    # dihedral featurizer
    dih_w, dih_b = lin(6, D)
    p["dih_w"] = bf16(dih_w)
    p["dih_b"] = dih_b.reshape(1, D)
    p["dih_norm_g"] = jnp.ones((1, D), jnp.float32)
    p["dih_norm_b"] = jnp.zeros((1, D), jnp.float32)

    # GVP node embedding (vector-channel mixes stay f32: plain einsums on the VPU)
    p["gvp_wh"], _ = lin(3, h, bias=False)
    gvp_ws, gvp_bs = lin(7 + h, Hs)
    p["gvp_ws"], p["gvp_bs"] = bf16(gvp_ws), gvp_bs.reshape(1, Hs)
    p["gvp_wv"], _ = lin(h, Hv, bias=False)
    p["gvp_ln_g"] = jnp.ones((1, Hs), jnp.float32)
    p["gvp_ln_b"] = jnp.zeros((1, Hs), jnp.float32)
    gcw, gcb = lin(16, Hs)
    p["gvp_conf_w"], p["gvp_conf_b"] = bf16(gcw), gcb.reshape(1, Hs)

    # fused embedding projection: [rbf16(conf) | gvp_input(15) | gvp_output(Hs+3Hv)] -> D
    conf_w, conf_b = lin(16, D)
    gin_w, gin_b = lin(15, D)
    gout_w, gout_b = lin(Hs + 3 * Hv, D)
    p["emb_cat_w"] = bf16(jnp.concatenate([conf_w, gin_w, gout_w], axis=0))
    p["emb_cat_b"] = (conf_b + gin_b + gout_b).reshape(1, D)

    scale = (D // H) ** -0.5
    layers = []
    for _ in range(cfg["layers"]):
        lp = {
            "ln1_g": jnp.ones((1, D), jnp.float32), "ln1_b": jnp.zeros((1, D), jnp.float32),
            "ln2_g": jnp.ones((1, D), jnp.float32), "ln2_b": jnp.zeros((1, D), jnp.float32),
        }
        wq, bq = lin(D, D)
        wk, bk = lin(D, D)
        wv, bv = lin(D, D)
        # softmax scale folded into the query projection (zero runtime cost)
        lp["wq"] = bf16(wq * scale)
        lp["bq"] = (bq * scale).reshape(1, D)
        lp["wkv"] = bf16(jnp.concatenate([wk, wv], axis=1))          # (D, 2D)
        lp["bkv"] = jnp.concatenate([bk, bv]).reshape(1, 2 * D)
        wo, bo = lin(D, D)
        lp["wo"], lp["bo"] = bf16(wo), bo.reshape(1, D)
        w1, b1 = lin(D, F)
        lp["fc1_w"], lp["fc1_b"] = bf16(w1), b1.reshape(1, F)
        w2, b2 = lin(F, D)
        lp["fc2_w"], lp["fc2_b"] = bf16(w2), b2.reshape(1, D)
        layers.append(lp)
    p["layers"] = layers
    p["final_ln_g"] = jnp.ones((1, D), jnp.float32)
    p["final_ln_b"] = jnp.zeros((1, D), jnp.float32)
    return p


# ----------------------------------------------------------------------------
# Main
# ----------------------------------------------------------------------------

if __name__ == "__main__":
    cfg = dict(embed_dim=32, heads=4, ffn=64, layers=2, vocab=35,
               padding_idx=1, mask_idx=30, gvp_hs=16, gvp_hv=4)
    B, N = 2, 8

    key = jax.random.PRNGKey(0)
    kp, kc, kconf = jax.random.split(key, 3)
    params = init_params(kp, cfg)

    coords = jax.random.normal(kc, (B, N, 3, 3), jnp.float32) * 3.0
    padding_mask = jnp.zeros((B, N), dtype=bool).at[1, 6:].set(True)
    coords = jnp.where(padding_mask[:, :, None, None], jnp.nan, coords)
    confidence = jax.random.uniform(kconf, (B, N), jnp.float32)
    confidence = jnp.where(padding_mask, -1.0, confidence)

    fwd = jax.jit(lambda c, m, cf: gvp_transformer_encoder_forward(params, c, m, cf, cfg))
    out = fwd(coords, padding_mask, confidence)
    x = jax.block_until_ready(out["encoder_out"][0])

    assert x.shape == (N, B, cfg["embed_dim"])
    assert bool(jnp.all(jnp.isfinite(x)))
    print("KERNEL_OK")
</pallas_src>

<mosaic_0001>
module attributes {stable_mosaic.version = 11 : i64} {
  func.func @_copy(%arg0: i32, %arg1: memref<8x128xf32, #tpu.memory_space<vmem>>, %arg2: memref<8x128xf32, #tpu.memory_space<vmem>>) attributes {dimension_semantics = [#tpu.dimension_semantics<arbitrary>], iteration_bounds = array<i64: 1>, scalar_prefetch = 0 : i64, scratch_operands = 0 : i64, tpu.core_type = #tpu.core_type<tc>, window_params = [{pipeline_mode = #tpu.pipeline_mode<synchronous>, transform_indices = @transform_0, window_bounds = array<i64: 8, 128>}, {transform_indices = @transform_1, window_bounds = array<i64: 8, 128>}]} {
    %c0 = arith.constant 0 : index
    %c0_0 = arith.constant 0 : index
    %0 = vector.load %arg1[%c0, %c0_0] : memref<8x128xf32, #tpu.memory_space<vmem>>, vector<8x128xf32>
    %c0_1 = arith.constant 0 : index
    %c0_2 = arith.constant 0 : index
    %1 = vector.load %arg2[%c0_1, %c0_2] : memref<8x128xf32, #tpu.memory_space<vmem>>, vector<8x128xf32>
    tpu.vector_store %arg2[%c0_1, %c0_2], %0 {strides = array<i32>} : memref<8x128xf32, #tpu.memory_space<vmem>>, vector<8x128xf32>,
    return
  }
  func.func @transform_0(%arg0: i32) -> (i32, i32) {
    %c0_i32 = arith.constant 0 : i32
    %c0_i32_0 = arith.constant 0 : i32
    %c0_i32_1 = arith.constant 0 : i32
    return %c0_i32, %c0_i32_0 : i32, i32
  }
  func.func @transform_1(%arg0: i32) -> (i32, i32) {
    %c0_i32 = arith.constant 0 : i32
    %c0_i32_0 = arith.constant 0 : i32
    return %arg0, %c0_i32 : i32, i32
  }
}

module attributes {stable_mosaic.version = 11 : i64} {
  func.func @_gvp_scalar_kernel(%arg0: i32, %arg1: memref<16x11xf32, #tpu.memory_space<vmem>>, %arg2: memref<16x16xf32, #tpu.memory_space<vmem>>, %arg3: memref<11x16xbf16, #tpu.memory_space<vmem>>, %arg4: memref<1x16xf32, #tpu.memory_space<vmem>>, %arg5: memref<1x16xf32, #tpu.memory_space<vmem>>, %arg6: memref<1x16xf32, #tpu.memory_space<vmem>>, %arg7: memref<16x16xbf16, #tpu.memory_space<vmem>>, %arg8: memref<1x16xf32, #tpu.memory_space<vmem>>, %arg9: memref<16x16xf32, #tpu.memory_space<vmem>>) attributes {dimension_semantics = [#tpu.dimension_semantics<parallel>], iteration_bounds = array<i64: 1>, scalar_prefetch = 0 : i64, scratch_operands = 0 : i64, tpu.core_type = #tpu.core_type<tc>, window_params = [{transform_indices = @transform_0, window_bounds = array<i64: 16, 11>}, {transform_indices = @transform_1, window_bounds = array<i64: 16, 16>}, {pipeline_mode = #tpu.pipeline_mode<synchronous>, transform_indices = @transform_2, window_bounds = array<i64: 11, 16>}, {pipeline_mode = #tpu.pipeline_mode<synchronous>, transform_indices = @transform_3, window_bounds = array<i64: 1, 16>}, {pipeline_mode = #tpu.pipeline_mode<synchronous>, transform_indices = @transform_4, window_bounds = array<i64: 1, 16>}, {pipeline_mode = #tpu.pipeline_mode<synchronous>, transform_indices = @transform_5, window_bounds = array<i64: 1, 16>}, {pipeline_mode = #tpu.pipeline_mode<synchronous>, transform_indices = @transform_6, window_bounds = array<i64: 16, 16>}, {pipeline_mode = #tpu.pipeline_mode<synchronous>, transform_indices = @transform_7, window_bounds = array<i64: 1, 16>}, {transform_indices = @transform_8, window_bounds = array<i64: 16, 16>}]} {
    %c0 = arith.constant 0 : index
    %c0_0 = arith.constant 0 : index
    %0 = vector.load %arg1[%c0, %c0_0] : memref<16x11xf32, #tpu.memory_space<vmem>>, vector<16x11xf32>
    %1 = arith.truncf %0 : vector<16x11xf32> to vector<16x11xbf16>
    %c0_1 = arith.constant 0 : index
    %c0_2 = arith.constant 0 : index
    %2 = vector.load %arg3[%c0_1, %c0_2] : memref<11x16xbf16, #tpu.memory_space<vmem>>, vector<11x16xbf16>
    %cst = arith.constant dense<0.000000e+00> : vector<16x16xf32>
    %3 = tpu.matmul %1, %2, %cst {dimension_numbers = #tpu.dot_dimension_numbers<[1], [0], [0], [1], [0, 0, 1, 1], [], []>} : vector<16x11xbf16>, vector<11x16xbf16>, vector<16x16xf32> -> vector<16x16xf32>
    %c0_3 = arith.constant 0 : index
    %c0_4 = arith.constant 0 : index
    %4 = vector.load %arg4[%c0_3, %c0_4] : memref<1x16xf32, #tpu.memory_space<vmem>>, vector<1x16xf32>
    %5 = vector.broadcast %4 : vector<1x16xf32> to vector<16x16xf32>
    %6 = arith.addf %3, %5 : vector<16x16xf32>
    %cst_5 = arith.constant dense<0.000000e+00> : vector<16xf32>
    %7 = vector.multi_reduction <add>, %6, %cst_5 [1] : vector<16x16xf32> to vector<16xf32>
    %8 = vector.shape_cast %7 : vector<16xf32> to vector<16x1xf32>
    %cst_6 = arith.constant 1.600000e+01 : f32
    %9 = vector.broadcast %cst_6 : f32 to vector<16x1xf32>
    %10 = arith.divf %8, %9 : vector<16x1xf32>
    %11 = vector.broadcast %10 : vector<16x1xf32> to vector<16x16xf32>
    %12 = arith.subf %6, %11 : vector<16x16xf32>
    %13 = arith.mulf %12, %12 : vector<16x16xf32>
    %cst_7 = arith.constant dense<0.000000e+00> : vector<16xf32>
    %14 = vector.multi_reduction <add>, %13, %cst_7 [1] : vector<16x16xf32> to vector<16xf32>
    %15 = vector.shape_cast %14 : vector<16xf32> to vector<16x1xf32>
    %cst_8 = arith.constant 1.600000e+01 : f32
    %16 = vector.broadcast %cst_8 : f32 to vector<16x1xf32>
    %17 = arith.divf %15, %16 : vector<16x1xf32>
    %cst_9 = arith.constant 9.99999974E-6 : f32
    %18 = vector.broadcast %cst_9 : f32 to vector<16x1xf32>
    %19 = arith.addf %17, %18 : vector<16x1xf32>
    %20 = math.rsqrt %19 : vector<16x1xf32>
    %21 = vector.broadcast %20 : vector<16x1xf32> to vector<16x16xf32>
    %22 = arith.mulf %12, %21 : vector<16x16xf32>
    %c0_10 = arith.constant 0 : index
    %c0_11 = arith.constant 0 : index
    %23 = vector.load %arg5[%c0_10, %c0_11] : memref<1x16xf32, #tpu.memory_space<vmem>>, vector<1x16xf32>
    %24 = vector.broadcast %23 : vector<1x16xf32> to vector<16x16xf32>
    %25 = arith.mulf %22, %24 : vector<16x16xf32>
    %c0_12 = arith.constant 0 : index
    %c0_13 = arith.constant 0 : index
    %26 = vector.load %arg6[%c0_12, %c0_13] : memref<1x16xf32, #tpu.memory_space<vmem>>, vector<1x16xf32>
    %27 = vector.broadcast %26 : vector<1x16xf32> to vector<16x16xf32>
    %28 = arith.addf %25, %27 : vector<16x16xf32>
    %c0_14 = arith.constant 0 : index
    %c0_15 = arith.constant 0 : index
    %29 = vector.load %arg2[%c0_14, %c0_15] : memref<16x16xf32, #tpu.memory_space<vmem>>, vector<16x16xf32>
    %30 = arith.truncf %29 : vector<16x16xf32> to vector<16x16xbf16>
    %c0_16 = arith.constant 0 : index
    %c0_17 = arith.constant 0 : index
    %31 = vector.load %arg7[%c0_16, %c0_17] : memref<16x16xbf16, #tpu.memory_space<vmem>>, vector<16x16xbf16>
    %cst_18 = arith.constant dense<0.000000e+00> : vector<16x16xf32>
    %32 = tpu.matmul %30, %31, %cst_18 {dimension_numbers = #tpu.dot_dimension_numbers<[1], [0], [0], [1], [0, 0, 1, 1], [], []>} : vector<16x16xbf16>, vector<16x16xbf16>, vector<16x16xf32> -> vector<16x16xf32>
    %33 = arith.addf %28, %32 : vector<16x16xf32>
    %c0_19 = arith.constant 0 : index
    %c0_20 = arith.constant 0 : index
    %34 = vector.load %arg8[%c0_19, %c0_20] : memref<1x16xf32, #tpu.memory_space<vmem>>, vector<1x16xf32>
    %35 = vector.broadcast %34 : vector<1x16xf32> to vector<16x16xf32>
    %36 = arith.addf %33, %35 : vector<16x16xf32>
    %c0_21 = arith.constant 0 : index
    %c0_22 = arith.constant 0 : index
    %37 = vector.load %arg9[%c0_21, %c0_22] : memref<16x16xf32, #tpu.memory_space<vmem>>, vector<16x16xf32>
    tpu.vector_store %arg9[%c0_21, %c0_22], %36 {strides = array<i32>} : memref<16x16xf32, #tpu.memory_space<vmem>>, vector<16x16xf32>,
    return
  }
  func.func @transform_0(%arg0: i32) -> (i32, i32) {
    %c0_i32 = arith.constant 0 : i32
    %c0_i32_0 = arith.constant 0 : i32
    return %arg0, %c0_i32 : i32, i32
  }
  func.func @transform_1(%arg0: i32) -> (i32, i32) {
    %c0_i32 = arith.constant 0 : i32
    %c0_i32_0 = arith.constant 0 : i32
    return %arg0, %c0_i32 : i32, i32
  }
  func.func @transform_2(%arg0: i32) -> (i32, i32) {
    %c0_i32 = arith.constant 0 : i32
    %c0_i32_0 = arith.constant 0 : i32
    %c0_i32_1 = arith.constant 0 : i32
    return %c0_i32, %c0_i32_0 : i32, i32
  }
  func.func @transform_3(%arg0: i32) -> (i32, i32) {
    %c0_i32 = arith.constant 0 : i32
    %c0_i32_0 = arith.constant 0 : i32
    %c0_i32_1 = arith.constant 0 : i32
    return %c0_i32, %c0_i32_0 : i32, i32
  }
  func.func @transform_4(%arg0: i32) -> (i32, i32) {
    %c0_i32 = arith.constant 0 : i32
    %c0_i32_0 = arith.constant 0 : i32
    %c0_i32_1 = arith.constant 0 : i32
    return %c0_i32, %c0_i32_0 : i32, i32
  }
  func.func @transform_5(%arg0: i32) -> (i32, i32) {
    %c0_i32 = arith.constant 0 : i32
    %c0_i32_0 = arith.constant 0 : i32
    %c0_i32_1 = arith.constant 0 : i32
    return %c0_i32, %c0_i32_0 : i32, i32
  }
  func.func @transform_6(%arg0: i32) -> (i32, i32) {
    %c0_i32 = arith.constant 0 : i32
    %c0_i32_0 = arith.constant 0 : i32
    %c0_i32_1 = arith.constant 0 : i32
    return %c0_i32, %c0_i32_0 : i32, i32
  }
  func.func @transform_7(%arg0: i32) -> (i32, i32) {
    %c0_i32 = arith.constant 0 : i32
    %c0_i32_0 = arith.constant 0 : i32
    %c0_i32_1 = arith.constant 0 : i32
    return %c0_i32, %c0_i32_0 : i32, i32
  }
  func.func @transform_8(%arg0: i32) -> (i32, i32) {
    %c0_i32 = arith.constant 0 : i32
    %c0_i32_0 = arith.constant 0 : i32
    return %arg0, %c0_i32 : i32, i32
  }
}

module attributes {stable_mosaic.version = 11 : i64} {
  func.func @_embed_fusion_kernel(%arg0: i32, %arg1: memref<16x32xf32, #tpu.memory_space<vmem>>, %arg2: memref<16x32xf32, #tpu.memory_space<vmem>>, %arg3: memref<16x6xf32, #tpu.memory_space<vmem>>, %arg4: memref<16x59xf32, #tpu.memory_space<vmem>>, %arg5: memref<16x1xf32, #tpu.memory_space<vmem>>, %arg6: memref<6x32xbf16, #tpu.memory_space<vmem>>, %arg7: memref<1x32xf32, #tpu.memory_space<vmem>>, %arg8: memref<1x32xf32, #tpu.memory_space<vmem>>, %arg9: memref<1x32xf32, #tpu.memory_space<vmem>>, %arg10: memref<59x32xbf16, #tpu.memory_space<vmem>>, %arg11: memref<1x32xf32, #tpu.memory_space<vmem>>, %arg12: memref<16x32xf32, #tpu.memory_space<vmem>>, %arg13: memref<16x32xf32, #tpu.memory_space<vmem>>) attributes {dimension_semantics = [#tpu.dimension_semantics<parallel>], iteration_bounds = array<i64: 1>, scalar_prefetch = 0 : i64, scratch_operands = 0 : i64, tpu.core_type = #tpu.core_type<tc>, window_params = [{transform_indices = @transform_0, window_bounds = array<i64: 16, 32>}, {transform_indices = @transform_1, window_bounds = array<i64: 16, 32>}, {transform_indices = @transform_2, window_bounds = array<i64: 16, 6>}, {transform_indices = @transform_3, window_bounds = array<i64: 16, 59>}, {transform_indices = @transform_4, window_bounds = array<i64: 16, 1>}, {pipeline_mode = #tpu.pipeline_mode<synchronous>, transform_indices = @transform_5, window_bounds = array<i64: 6, 32>}, {pipeline_mode = #tpu.pipeline_mode<synchronous>, transform_indices = @transform_6, window_bounds = array<i64: 1, 32>}, {pipeline_mode = #tpu.pipeline_mode<synchronous>, transform_indices = @transform_7, window_bounds = array<i64: 1, 32>}, {pipeline_mode = #tpu.pipeline_mode<synchronous>, transform_indices = @transform_8, window_bounds = array<i64: 1, 32>}, {pipeline_mode = #tpu.pipeline_mode<synchronous>, transform_indices = @transform_9, window_bounds = array<i64: 59, 32>}, {pipeline_mode = #tpu.pipeline_mode<synchronous>, transform_indices = @transform_10, window_bounds = array<i64: 1, 32>}, {transform_indices = @transform_11, window_bounds = array<i64: 16, 32>}, {transform_indices = @transform_12, window_bounds = array<i64: 16, 32>}]} {
    %c0 = arith.constant 0 : index
    %c0_0 = arith.constant 0 : index
    %0 = vector.load %arg3[%c0, %c0_0] : memref<16x6xf32, #tpu.memory_space<vmem>>, vector<16x6xf32>
    %1 = arith.truncf %0 : vector<16x6xf32> to vector<16x6xbf16>
    %c0_1 = arith.constant 0 : index
    %c0_2 = arith.constant 0 : index
    %2 = vector.load %arg6[%c0_1, %c0_2] : memref<6x32xbf16, #tpu.memory_space<vmem>>, vector<6x32xbf16>
    %cst = arith.constant dense<0.000000e+00> : vector<16x32xf32>
    %3 = tpu.matmul %1, %2, %cst {dimension_numbers = #tpu.dot_dimension_numbers<[1], [0], [0], [1], [0, 0, 1, 1], [], []>} : vector<16x6xbf16>, vector<6x32xbf16>, vector<16x32xf32> -> vector<16x32xf32>
    %c0_3 = arith.constant 0 : index
    %c0_4 = arith.constant 0 : index
    %4 = vector.load %arg7[%c0_3, %c0_4] : memref<1x32xf32, #tpu.memory_space<vmem>>, vector<1x32xf32>
    %5 = vector.broadcast %4 : vector<1x32xf32> to vector<16x32xf32>
    %6 = arith.addf %3, %5 : vector<16x32xf32>
    %cst_5 = arith.constant dense<0.000000e+00> : vector<16xf32>
    %7 = vector.multi_reduction <add>, %6, %cst_5 [1] : vector<16x32xf32> to vector<16xf32>
    %8 = vector.shape_cast %7 : vector<16xf32> to vector<16x1xf32>
    %cst_6 = arith.constant 3.200000e+01 : f32
    %9 = vector.broadcast %cst_6 : f32 to vector<16x1xf32>
    %10 = arith.divf %8, %9 : vector<16x1xf32>
    %11 = vector.broadcast %10 : vector<16x1xf32> to vector<16x32xf32>
    %12 = arith.subf %6, %11 : vector<16x32xf32>
    %13 = arith.mulf %12, %12 : vector<16x32xf32>
    %cst_7 = arith.constant dense<0.000000e+00> : vector<16xf32>
    %14 = vector.multi_reduction <add>, %13, %cst_7 [1] : vector<16x32xf32> to vector<16xf32>
    %15 = vector.shape_cast %14 : vector<16xf32> to vector<16x1xf32>
    %cst_8 = arith.constant 3.100000e+01 : f32
    %16 = vector.broadcast %cst_8 : f32 to vector<16x1xf32>
    %17 = arith.divf %15, %16 : vector<16x1xf32>
    %cst_9 = arith.constant 9.99999997E-7 : f32
    %18 = vector.broadcast %cst_9 : f32 to vector<16x1xf32>
    %19 = arith.addf %17, %18 : vector<16x1xf32>
    %20 = math.sqrt %19 : vector<16x1xf32>
    %cst_10 = arith.constant 9.99999997E-7 : f32
    %21 = vector.broadcast %cst_10 : f32 to vector<16x1xf32>
    %22 = arith.addf %20, %21 : vector<16x1xf32>
    %23 = vector.broadcast %22 : vector<16x1xf32> to vector<16x32xf32>
    %24 = arith.divf %12, %23 : vector<16x32xf32>
    %c0_11 = arith.constant 0 : index
    %c0_12 = arith.constant 0 : index
    %25 = vector.load %arg8[%c0_11, %c0_12] : memref<1x32xf32, #tpu.memory_space<vmem>>, vector<1x32xf32>
    %26 = vector.broadcast %25 : vector<1x32xf32> to vector<16x32xf32>
    %27 = arith.mulf %24, %26 : vector<16x32xf32>
    %c0_13 = arith.constant 0 : index
    %c0_14 = arith.constant 0 : index
    %28 = vector.load %arg9[%c0_13, %c0_14] : memref<1x32xf32, #tpu.memory_space<vmem>>, vector<1x32xf32>
    %29 = vector.broadcast %28 : vector<1x32xf32> to vector<16x32xf32>
    %30 = arith.addf %27, %29 : vector<16x32xf32>
    %c0_15 = arith.constant 0 : index
    %c0_16 = arith.constant 0 : index
    %31 = vector.load %arg4[%c0_15, %c0_16] : memref<16x59xf32, #tpu.memory_space<vmem>>, vector<16x59xf32>
    %32 = arith.truncf %31 : vector<16x59xf32> to vector<16x59xbf16>
    %c0_17 = arith.constant 0 : index
    %c0_18 = arith.constant 0 : index
    %33 = vector.load %arg10[%c0_17, %c0_18] : memref<59x32xbf16, #tpu.memory_space<vmem>>, vector<59x32xbf16>
    %cst_19 = arith.constant dense<0.000000e+00> : vector<16x32xf32>
    %34 = tpu.matmul %32, %33, %cst_19 {dimension_numbers = #tpu.dot_dimension_numbers<[1], [0], [0], [1], [0, 0, 1, 1], [], []>} : vector<16x59xbf16>, vector<59x32xbf16>, vector<16x32xf32> -> vector<16x32xf32>
    %c0_20 = arith.constant 0 : index
    %c0_21 = arith.constant 0 : index
    %35 = vector.load %arg11[%c0_20, %c0_21] : memref<1x32xf32, #tpu.memory_space<vmem>>, vector<1x32xf32>
    %36 = vector.broadcast %35 : vector<1x32xf32> to vector<16x32xf32>
    %37 = arith.addf %34, %36 : vector<16x32xf32>
    %c0_22 = arith.constant 0 : index
    %c0_23 = arith.constant 0 : index
    %38 = vector.load %arg1[%c0_22, %c0_23] : memref<16x32xf32, #tpu.memory_space<vmem>>, vector<16x32xf32>
    %39 = arith.addf %38, %30 : vector<16x32xf32>
    %40 = arith.addf %39, %37 : vector<16x32xf32>
    %c0_24 = arith.constant 0 : index
    %c0_25 = arith.constant 0 : index
    %41 = vector.load %arg12[%c0_24, %c0_25] : memref<16x32xf32, #tpu.memory_space<vmem>>, vector<16x32xf32>
    tpu.vector_store %arg12[%c0_24, %c0_25], %40 {strides = array<i32>} : memref<16x32xf32, #tpu.memory_space<vmem>>, vector<16x32xf32>,
    %c0_26 = arith.constant 0 : index
    %c0_27 = arith.constant 0 : index
    %42 = vector.load %arg2[%c0_26, %c0_27] : memref<16x32xf32, #tpu.memory_space<vmem>>, vector<16x32xf32>
    %43 = arith.addf %40, %42 : vector<16x32xf32>
    %c0_28 = arith.constant 0 : index
    %c0_29 = arith.constant 0 : index
    %44 = vector.load %arg5[%c0_28, %c0_29] : memref<16x1xf32, #tpu.memory_space<vmem>>, vector<16x1xf32>
    %cst_30 = arith.constant 1.000000e+00 : f32
    %45 = vector.broadcast %cst_30 : f32 to vector<16x1xf32>
    %46 = arith.subf %45, %44 : vector<16x1xf32>
    %47 = vector.broadcast %46 : vector<16x1xf32> to vector<16x32xf32>
    %48 = arith.mulf %43, %47 : vector<16x32xf32>
    %c0_31 = arith.constant 0 : index
    %c0_32 = arith.constant 0 : index
    %49 = vector.load %arg13[%c0_31, %c0_32] : memref<16x32xf32, #tpu.memory_space<vmem>>, vector<16x32xf32>
    tpu.vector_store %arg13[%c0_31, %c0_32], %48 {strides = array<i32>} : memref<16x32xf32, #tpu.memory_space<vmem>>, vector<16x32xf32>,
    return
  }
  func.func @transform_0(%arg0: i32) -> (i32, i32) {
    %c0_i32 = arith.constant 0 : i32
    %c0_i32_0 = arith.constant 0 : i32
    return %arg0, %c0_i32 : i32, i32
  }
  func.func @transform_1(%arg0: i32) -> (i32, i32) {
    %c0_i32 = arith.constant 0 : i32
    %c0_i32_0 = arith.constant 0 : i32
    return %arg0, %c0_i32 : i32, i32
  }
  func.func @transform_2(%arg0: i32) -> (i32, i32) {
    %c0_i32 = arith.constant 0 : i32
    %c0_i32_0 = arith.constant 0 : i32
    return %arg0, %c0_i32 : i32, i32
  }
  func.func @transform_3(%arg0: i32) -> (i32, i32) {
    %c0_i32 = arith.constant 0 : i32
    %c0_i32_0 = arith.constant 0 : i32
    return %arg0, %c0_i32 : i32, i32
  }
  func.func @transform_4(%arg0: i32) -> (i32, i32) {
    %c0_i32 = arith.constant 0 : i32
    %c0_i32_0 = arith.constant 0 : i32
    return %arg0, %c0_i32 : i32, i32
  }
  func.func @transform_5(%arg0: i32) -> (i32, i32) {
    %c0_i32 = arith.constant 0 : i32
    %c0_i32_0 = arith.constant 0 : i32
    %c0_i32_1 = arith.constant 0 : i32
    return %c0_i32, %c0_i32_0 : i32, i32
  }
  func.func @transform_6(%arg0: i32) -> (i32, i32) {
    %c0_i32 = arith.constant 0 : i32
    %c0_i32_0 = arith.constant 0 : i32
    %c0_i32_1 = arith.constant 0 : i32
    return %c0_i32, %c0_i32_0 : i32, i32
  }
  func.func @transform_7(%arg0: i32) -> (i32, i32) {
    %c0_i32 = arith.constant 0 : i32
    %c0_i32_0 = arith.constant 0 : i32
    %c0_i32_1 = arith.constant 0 : i32
    return %c0_i32, %c0_i32_0 : i32, i32
  }
  func.func @transform_8(%arg0: i32) -> (i32, i32) {
    %c0_i32 = arith.constant 0 : i32
    %c0_i32_0 = arith.constant 0 : i32
    %c0_i32_1 = arith.constant 0 : i32
    return %c0_i32, %c0_i32_0 : i32, i32
  }
  func.func @transform_9(%arg0: i32) -> (i32, i32) {
    %c0_i32 = arith.constant 0 : i32
    %c0_i32_0 = arith.constant 0 : i32
    %c0_i32_1 = arith.constant 0 : i32
    return %c0_i32, %c0_i32_0 : i32, i32
  }
  func.func @transform_10(%arg0: i32) -> (i32, i32) {
    %c0_i32 = arith.constant 0 : i32
    %c0_i32_0 = arith.constant 0 : i32
    %c0_i32_1 = arith.constant 0 : i32
    return %c0_i32, %c0_i32_0 : i32, i32
  }
  func.func @transform_11(%arg0: i32) -> (i32, i32) {
    %c0_i32 = arith.constant 0 : i32
    %c0_i32_0 = arith.constant 0 : i32
    return %arg0, %c0_i32 : i32, i32
  }
  func.func @transform_12(%arg0: i32) -> (i32, i32) {
    %c0_i32 = arith.constant 0 : i32
    %c0_i32_0 = arith.constant 0 : i32
    return %arg0, %c0_i32 : i32, i32
  }
}

module attributes {stable_mosaic.version = 11 : i64} {
  func.func @_fused_attn_kernel(%arg0: i32, %arg1: i32, %arg2: memref<1x8x32xf32, #tpu.memory_space<vmem>>, %arg3: memref<1x1x8xf32, #tpu.memory_space<vmem>>, %arg4: memref<1x32xf32, #tpu.memory_space<vmem>>, %arg5: memref<1x32xf32, #tpu.memory_space<vmem>>, %arg6: memref<32x32xbf16, #tpu.memory_space<vmem>>, %arg7: memref<1x32xf32, #tpu.memory_space<vmem>>, %arg8: memref<32x64xbf16, #tpu.memory_space<vmem>>, %arg9: memref<1x64xf32, #tpu.memory_space<vmem>>, %arg10: memref<32x32xbf16, #tpu.memory_space<vmem>>, %arg11: memref<1x32xf32, #tpu.memory_space<vmem>>, %arg12: memref<1x8x32xf32, #tpu.memory_space<vmem>>, %arg13: memref<8x32xbf16, #tpu.memory_space<vmem>>, %arg14: memref<8x32xbf16, #tpu.memory_space<vmem>>, %arg15: memref<8x32xbf16, #tpu.memory_space<vmem>>) attributes {dimension_semantics = [#tpu.dimension_semantics<parallel>, #tpu.dimension_semantics<arbitrary>], iteration_bounds = array<i64: 2, 1>, scalar_prefetch = 0 : i64, scratch_operands = 3 : i64, tpu.core_type = #tpu.core_type<tc>, window_params = [{transform_indices = @transform_0, window_bounds = array<i64: 1, 8, 32>}, {transform_indices = @transform_1, window_bounds = array<i64: 1, 1, 8>}, {pipeline_mode = #tpu.pipeline_mode<synchronous>, transform_indices = @transform_2, window_bounds = array<i64: 1, 32>}, {pipeline_mode = #tpu.pipeline_mode<synchronous>, transform_indices = @transform_3, window_bounds = array<i64: 1, 32>}, {pipeline_mode = #tpu.pipeline_mode<synchronous>, transform_indices = @transform_4, window_bounds = array<i64: 32, 32>}, {pipeline_mode = #tpu.pipeline_mode<synchronous>, transform_indices = @transform_5, window_bounds = array<i64: 1, 32>}, {pipeline_mode = #tpu.pipeline_mode<synchronous>, transform_indices = @transform_6, window_bounds = array<i64: 32, 64>}, {pipeline_mode = #tpu.pipeline_mode<synchronous>, transform_indices = @transform_7, window_bounds = array<i64: 1, 64>}, {pipeline_mode = #tpu.pipeline_mode<synchronous>, transform_indices = @transform_8, window_bounds = array<i64: 32, 32>}, {pipeline_mode = #tpu.pipeline_mode<synchronous>, transform_indices = @transform_9, window_bounds = array<i64: 1, 32>}, {transform_indices = @transform_10, window_bounds = array<i64: 1, 8, 32>}]} {
    %c0_i32 = arith.constant 0 : i32
    %0 = arith.cmpi eq, %arg1, %c0_i32 : i32
    %1 = arith.extui %0 : i1 to i32
    %c0_i32_0 = arith.constant 0 : i32
    %2 = arith.cmpi ne, %1, %c0_i32_0 : i32
    scf.if %2 {
      %c0_66 = arith.constant 0 : index
      %c0_67 = arith.constant 0 : index
      %c0_68 = arith.constant 0 : index
      %134 = vector.load %arg2[%c0_66, %c0_67, %c0_68] : memref<1x8x32xf32, #tpu.memory_space<vmem>>, vector<1x8x32xf32>
      %135 = vector.shape_cast %134 : vector<1x8x32xf32> to vector<8x32xf32>
      %cst_69 = arith.constant dense<0.000000e+00> : vector<8xf32>
      %136 = vector.multi_reduction <add>, %135, %cst_69 [1] : vector<8x32xf32> to vector<8xf32>
      %137 = vector.shape_cast %136 : vector<8xf32> to vector<8x1xf32>
      %cst_70 = arith.constant 3.200000e+01 : f32
      %138 = vector.broadcast %cst_70 : f32 to vector<8x1xf32>
      %139 = arith.divf %137, %138 : vector<8x1xf32>
      %140 = vector.broadcast %139 : vector<8x1xf32> to vector<8x32xf32>
      %141 = arith.subf %135, %140 : vector<8x32xf32>
      %142 = arith.mulf %141, %141 : vector<8x32xf32>
      %cst_71 = arith.constant dense<0.000000e+00> : vector<8xf32>
      %143 = vector.multi_reduction <add>, %142, %cst_71 [1] : vector<8x32xf32> to vector<8xf32>
      %144 = vector.shape_cast %143 : vector<8xf32> to vector<8x1xf32>
      %cst_72 = arith.constant 3.200000e+01 : f32
      %145 = vector.broadcast %cst_72 : f32 to vector<8x1xf32>
      %146 = arith.divf %144, %145 : vector<8x1xf32>
      %cst_73 = arith.constant 9.99999974E-6 : f32
      %147 = vector.broadcast %cst_73 : f32 to vector<8x1xf32>
      %148 = arith.addf %146, %147 : vector<8x1xf32>
      %149 = math.rsqrt %148 : vector<8x1xf32>
      %150 = vector.broadcast %149 : vector<8x1xf32> to vector<8x32xf32>
      %151 = arith.mulf %141, %150 : vector<8x32xf32>
      %c0_74 = arith.constant 0 : index
      %c0_75 = arith.constant 0 : index
      %152 = vector.load %arg4[%c0_74, %c0_75] : memref<1x32xf32, #tpu.memory_space<vmem>>, vector<1x32xf32>
      %153 = vector.broadcast %152 : vector<1x32xf32> to vector<8x32xf32>
      %154 = arith.mulf %151, %153 : vector<8x32xf32>
      %c0_76 = arith.constant 0 : index
      %c0_77 = arith.constant 0 : index
      %155 = vector.load %arg5[%c0_76, %c0_77] : memref<1x32xf32, #tpu.memory_space<vmem>>, vector<1x32xf32>
      %156 = vector.broadcast %155 : vector<1x32xf32> to vector<8x32xf32>
      %157 = arith.addf %154, %156 : vector<8x32xf32>
      %158 = arith.truncf %157 : vector<8x32xf32> to vector<8x32xbf16>
      %c0_78 = arith.constant 0 : index
      %c0_79 = arith.constant 0 : index
      %159 = vector.load %arg8[%c0_78, %c0_79] : memref<32x64xbf16, #tpu.memory_space<vmem>>, vector<32x64xbf16>
      %cst_80 = arith.constant dense<0.000000e+00> : vector<8x64xf32>
      %160 = tpu.matmul %158, %159, %cst_80 {dimension_numbers = #tpu.dot_dimension_numbers<[1], [0], [0], [1], [0, 0, 1, 1], [], []>} : vector<8x32xbf16>, vector<32x64xbf16>, vector<8x64xf32> -> vector<8x64xf32>
      %c0_81 = arith.constant 0 : index
      %c0_82 = arith.constant 0 : index
      %161 = vector.load %arg9[%c0_81, %c0_82] : memref<1x64xf32, #tpu.memory_space<vmem>>, vector<1x64xf32>
      %162 = vector.broadcast %161 : vector<1x64xf32> to vector<8x64xf32>
      %163 = arith.addf %160, %162 : vector<8x64xf32>
      %164 = vector.extract_strided_slice %163 {offsets = [0, 0], sizes = [8, 32], strides = [1, 1]} : vector<8x64xf32> to vector<8x32xf32>
      %165 = arith.truncf %164 : vector<8x32xf32> to vector<8x32xbf16>
      %c0_83 = arith.constant 0 : index
      %c0_84 = arith.constant 0 : index
      %166 = vector.load %arg13[%c0_83, %c0_84] : memref<8x32xbf16, #tpu.memory_space<vmem>>, vector<8x32xbf16>
      tpu.vector_store %arg13[%c0_83, %c0_84], %165 {strides = array<i32>} : memref<8x32xbf16, #tpu.memory_space<vmem>>, vector<8x32xbf16>,
      %167 = vector.extract_strided_slice %163 {offsets = [0, 32], sizes = [8, 32], strides = [1, 1]} : vector<8x64xf32> to vector<8x32xf32>
      %168 = arith.truncf %167 : vector<8x32xf32> to vector<8x32xbf16>
      %c0_85 = arith.constant 0 : index
      %c0_86 = arith.constant 0 : index
      %169 = vector.load %arg14[%c0_85, %c0_86] : memref<8x32xbf16, #tpu.memory_space<vmem>>, vector<8x32xbf16>
      tpu.vector_store %arg14[%c0_85, %c0_86], %168 {strides = array<i32>} : memref<8x32xbf16, #tpu.memory_space<vmem>>, vector<8x32xbf16>,
    } else {
    }
    %c8_i32 = arith.constant 8 : i32
    %3 = arith.muli %arg1, %c8_i32 : i32
    %4 = tpu.assume_multiple %3, 8 : i32
    %c0 = arith.constant 0 : index
    %5 = arith.index_cast %4 : i32 to index
    %c0_1 = arith.constant 0 : index
    %6 = vector.load %arg2[%c0, %5, %c0_1] : memref<1x8x32xf32, #tpu.memory_space<vmem>>, vector<1x8x32xf32>
    %7 = vector.shape_cast %6 : vector<1x8x32xf32> to vector<8x32xf32>
    %cst = arith.constant dense<0.000000e+00> : vector<8xf32>
    %8 = vector.multi_reduction <add>, %7, %cst [1] : vector<8x32xf32> to vector<8xf32>
    %9 = vector.shape_cast %8 : vector<8xf32> to vector<8x1xf32>
    %cst_2 = arith.constant 3.200000e+01 : f32
    %10 = vector.broadcast %cst_2 : f32 to vector<8x1xf32>
    %11 = arith.divf %9, %10 : vector<8x1xf32>
    %12 = vector.broadcast %11 : vector<8x1xf32> to vector<8x32xf32>
    %13 = arith.subf %7, %12 : vector<8x32xf32>
    %14 = arith.mulf %13, %13 : vector<8x32xf32>
    %cst_3 = arith.constant dense<0.000000e+00> : vector<8xf32>
    %15 = vector.multi_reduction <add>, %14, %cst_3 [1] : vector<8x32xf32> to vector<8xf32>
    %16 = vector.shape_cast %15 : vector<8xf32> to vector<8x1xf32>
    %cst_4 = arith.constant 3.200000e+01 : f32
    %17 = vector.broadcast %cst_4 : f32 to vector<8x1xf32>
    %18 = arith.divf %16, %17 : vector<8x1xf32>
    %cst_5 = arith.constant 9.99999974E-6 : f32
    %19 = vector.broadcast %cst_5 : f32 to vector<8x1xf32>
    %20 = arith.addf %18, %19 : vector<8x1xf32>
    %21 = math.rsqrt %20 : vector<8x1xf32>
    %22 = vector.broadcast %21 : vector<8x1xf32> to vector<8x32xf32>
    %23 = arith.mulf %13, %22 : vector<8x32xf32>
    %c0_6 = arith.constant 0 : index
    %c0_7 = arith.constant 0 : index
    %24 = vector.load %arg4[%c0_6, %c0_7] : memref<1x32xf32, #tpu.memory_space<vmem>>, vector<1x32xf32>
    %25 = vector.broadcast %24 : vector<1x32xf32> to vector<8x32xf32>
    %26 = arith.mulf %23, %25 : vector<8x32xf32>
    %c0_8 = arith.constant 0 : index
    %c0_9 = arith.constant 0 : index
    %27 = vector.load %arg5[%c0_8, %c0_9] : memref<1x32xf32, #tpu.memory_space<vmem>>, vector<1x32xf32>
    %28 = vector.broadcast %27 : vector<1x32xf32> to vector<8x32xf32>
    %29 = arith.addf %26, %28 : vector<8x32xf32>
    %30 = arith.truncf %29 : vector<8x32xf32> to vector<8x32xbf16>
    %c0_10 = arith.constant 0 : index
    %c0_11 = arith.constant 0 : index
    %31 = vector.load %arg6[%c0_10, %c0_11] : memref<32x32xbf16, #tpu.memory_space<vmem>>, vector<32x32xbf16>
    %cst_12 = arith.constant dense<0.000000e+00> : vector<8x32xf32>
    %32 = tpu.matmul %30, %31, %cst_12 {dimension_numbers = #tpu.dot_dimension_numbers<[1], [0], [0], [1], [0, 0, 1, 1], [], []>} : vector<8x32xbf16>, vector<32x32xbf16>, vector<8x32xf32> -> vector<8x32xf32>
    %c0_13 = arith.constant 0 : index
    %c0_14 = arith.constant 0 : index
    %33 = vector.load %arg7[%c0_13, %c0_14] : memref<1x32xf32, #tpu.memory_space<vmem>>, vector<1x32xf32>
    %34 = vector.broadcast %33 : vector<1x32xf32> to vector<8x32xf32>
    %35 = arith.addf %32, %34 : vector<8x32xf32>
    %c0_15 = arith.constant 0 : index
    %c0_16 = arith.constant 0 : index
    %c0_17 = arith.constant 0 : index
    %36 = vector.load %arg3[%c0_15, %c0_16, %c0_17] : memref<1x1x8xf32, #tpu.memory_space<vmem>>, vector<1x1x8xf32>
    %37 = vector.shape_cast %36 : vector<1x1x8xf32> to vector<1x8xf32>
    %cst_18 = arith.constant -1.000000e+09 : f32
    %38 = vector.broadcast %cst_18 : f32 to vector<1x8xf32>
    %39 = arith.mulf %37, %38 : vector<1x8xf32>
    %40 = vector.extract_strided_slice %35 {offsets = [0, 0], sizes = [8, 8], strides = [1, 1]} : vector<8x32xf32> to vector<8x8xf32>
    %41 = arith.truncf %40 : vector<8x8xf32> to vector<8x8xbf16>
    %c0_19 = arith.constant 0 : index
    %c0_20 = arith.constant 0 : index
    %42 = vector.load %arg13[%c0_19, %c0_20] : memref<8x32xbf16, #tpu.memory_space<vmem>>, vector<8x8xbf16>
    %cst_21 = arith.constant dense<0.000000e+00> : vector<8x8xf32>
    %43 = tpu.matmul %41, %42, %cst_21 {dimension_numbers = #tpu.dot_dimension_numbers<[1], [1], [0], [0], [0, 0, 1, 0], [], []>} : vector<8x8xbf16>, vector<8x8xbf16>, vector<8x8xf32> -> vector<8x8xf32>
    %44 = vector.broadcast %39 : vector<1x8xf32> to vector<8x8xf32>
    %45 = arith.addf %43, %44 : vector<8x8xf32>
    %cst_22 = arith.constant dense<0xFF800000> : vector<8xf32>
    %46 = vector.multi_reduction <maximumf>, %45, %cst_22 [1] : vector<8x8xf32> to vector<8xf32>
    %47 = vector.shape_cast %46 : vector<8xf32> to vector<8x1xf32>
    %48 = vector.broadcast %47 : vector<8x1xf32> to vector<8x8xf32>
    %49 = arith.subf %45, %48 : vector<8x8xf32>
    %50 = math.exp %49 : vector<8x8xf32>
    %cst_23 = arith.constant dense<0.000000e+00> : vector<8xf32>
    %51 = vector.multi_reduction <add>, %50, %cst_23 [1] : vector<8x8xf32> to vector<8xf32>
    %52 = vector.shape_cast %51 : vector<8xf32> to vector<8x1xf32>
    %53 = tpu.reciprocal %52 {approx = true} : vector<8x1xf32> -> vector<8x1xf32>
    %54 = vector.broadcast %53 : vector<8x1xf32> to vector<8x8xf32>
    %55 = arith.mulf %50, %54 : vector<8x8xf32>
    %56 = arith.truncf %55 : vector<8x8xf32> to vector<8x8xbf16>
    %c0_24 = arith.constant 0 : index
    %c0_25 = arith.constant 0 : index
    %57 = vector.load %arg14[%c0_24, %c0_25] : memref<8x32xbf16, #tpu.memory_space<vmem>>, vector<8x8xbf16>
    %cst_26 = arith.constant dense<0.000000e+00> : vector<8x8xf32>
    %58 = tpu.matmul %56, %57, %cst_26 {dimension_numbers = #tpu.dot_dimension_numbers<[1], [0], [0], [1], [0, 0, 1, 1], [], []>} : vector<8x8xbf16>, vector<8x8xbf16>, vector<8x8xf32> -> vector<8x8xf32>
    %59 = arith.truncf %58 : vector<8x8xf32> to vector<8x8xbf16>
    %c0_27 = arith.constant 0 : index
    %c0_28 = arith.constant 0 : index
    %60 = vector.load %arg15[%c0_27, %c0_28] : memref<8x32xbf16, #tpu.memory_space<vmem>>, vector<8x8xbf16>
    tpu.vector_store %arg15[%c0_27, %c0_28], %59 {strides = array<i32>} : memref<8x32xbf16, #tpu.memory_space<vmem>>, vector<8x8xbf16>,
    %61 = vector.extract_strided_slice %35 {offsets = [0, 8], sizes = [8, 8], strides = [1, 1]} : vector<8x32xf32> to vector<8x8xf32>
    %62 = arith.truncf %61 : vector<8x8xf32> to vector<8x8xbf16>
    %c0_29 = arith.constant 0 : index
    %c8 = arith.constant 8 : index
    %63 = vector.load %arg13[%c0_29, %c8] : memref<8x32xbf16, #tpu.memory_space<vmem>>, vector<8x8xbf16>
    %cst_30 = arith.constant dense<0.000000e+00> : vector<8x8xf32>
    %64 = tpu.matmul %62, %63, %cst_30 {dimension_numbers = #tpu.dot_dimension_numbers<[1], [1], [0], [0], [0, 0, 1, 0], [], []>} : vector<8x8xbf16>, vector<8x8xbf16>, vector<8x8xf32> -> vector<8x8xf32>
    %65 = vector.broadcast %39 : vector<1x8xf32> to vector<8x8xf32>
    %66 = arith.addf %64, %65 : vector<8x8xf32>
    %cst_31 = arith.constant dense<0xFF800000> : vector<8xf32>
    %67 = vector.multi_reduction <maximumf>, %66, %cst_31 [1] : vector<8x8xf32> to vector<8xf32>
    %68 = vector.shape_cast %67 : vector<8xf32> to vector<8x1xf32>
    %69 = vector.broadcast %68 : vector<8x1xf32> to vector<8x8xf32>
    %70 = arith.subf %66, %69 : vector<8x8xf32>
    %71 = math.exp %70 : vector<8x8xf32>
    %cst_32 = arith.constant dense<0.000000e+00> : vector<8xf32>
    %72 = vector.multi_reduction <add>, %71, %cst_32 [1] : vector<8x8xf32> to vector<8xf32>
    %73 = vector.shape_cast %72 : vector<8xf32> to vector<8x1xf32>
    %74 = tpu.reciprocal %73 {approx = true} : vector<8x1xf32> -> vector<8x1xf32>
    %75 = vector.broadcast %74 : vector<8x1xf32> to vector<8x8xf32>
    %76 = arith.mulf %71, %75 : vector<8x8xf32>
    %77 = arith.truncf %76 : vector<8x8xf32> to vector<8x8xbf16>
    %c0_33 = arith.constant 0 : index
    %c8_34 = arith.constant 8 : index
    %78 = vector.load %arg14[%c0_33, %c8_34] : memref<8x32xbf16, #tpu.memory_space<vmem>>, vector<8x8xbf16>
    %cst_35 = arith.constant dense<0.000000e+00> : vector<8x8xf32>
    %79 = tpu.matmul %77, %78, %cst_35 {dimension_numbers = #tpu.dot_dimension_numbers<[1], [0], [0], [1], [0, 0, 1, 1], [], []>} : vector<8x8xbf16>, vector<8x8xbf16>, vector<8x8xf32> -> vector<8x8xf32>
    %80 = arith.truncf %79 : vector<8x8xf32> to vector<8x8xbf16>
    %c0_36 = arith.constant 0 : index
    %c8_37 = arith.constant 8 : index
    %81 = vector.load %arg15[%c0_36, %c8_37] : memref<8x32xbf16, #tpu.memory_space<vmem>>, vector<8x8xbf16>
    tpu.vector_store %arg15[%c0_36, %c8_37], %80 {strides = array<i32>} : memref<8x32xbf16, #tpu.memory_space<vmem>>, vector<8x8xbf16>,
    %82 = vector.extract_strided_slice %35 {offsets = [0, 16], sizes = [8, 8], strides = [1, 1]} : vector<8x32xf32> to vector<8x8xf32>
    %83 = arith.truncf %82 : vector<8x8xf32> to vector<8x8xbf16>
    %c0_38 = arith.constant 0 : index
    %c16 = arith.constant 16 : index
    %84 = vector.load %arg13[%c0_38, %c16] : memref<8x32xbf16, #tpu.memory_space<vmem>>, vector<8x8xbf16>
    %cst_39 = arith.constant dense<0.000000e+00> : vector<8x8xf32>
    %85 = tpu.matmul %83, %84, %cst_39 {dimension_numbers = #tpu.dot_dimension_numbers<[1], [1], [0], [0], [0, 0, 1, 0], [], []>} : vector<8x8xbf16>, vector<8x8xbf16>, vector<8x8xf32> -> vector<8x8xf32>
    %86 = vector.broadcast %39 : vector<1x8xf32> to vector<8x8xf32>
    %87 = arith.addf %85, %86 : vector<8x8xf32>
    %cst_40 = arith.constant dense<0xFF800000> : vector<8xf32>
    %88 = vector.multi_reduction <maximumf>, %87, %cst_40 [1] : vector<8x8xf32> to vector<8xf32>
    %89 = vector.shape_cast %88 : vector<8xf32> to vector<8x1xf32>
    %90 = vector.broadcast %89 : vector<8x1xf32> to vector<8x8xf32>
    %91 = arith.subf %87, %90 : vector<8x8xf32>
    %92 = math.exp %91 : vector<8x8xf32>
    %cst_41 = arith.constant dense<0.000000e+00> : vector<8xf32>
    %93 = vector.multi_reduction <add>, %92, %cst_41 [1] : vector<8x8xf32> to vector<8xf32>
    %94 = vector.shape_cast %93 : vector<8xf32> to vector<8x1xf32>
    %95 = tpu.reciprocal %94 {approx = true} : vector<8x1xf32> -> vector<8x1xf32>
    %96 = vector.broadcast %95 : vector<8x1xf32> to vector<8x8xf32>
    %97 = arith.mulf %92, %96 : vector<8x8xf32>
    %98 = arith.truncf %97 : vector<8x8xf32> to vector<8x8xbf16>
    %c0_42 = arith.constant 0 : index
    %c16_43 = arith.constant 16 : index
    %99 = vector.load %arg14[%c0_42, %c16_43] : memref<8x32xbf16, #tpu.memory_space<vmem>>, vector<8x8xbf16>
    %cst_44 = arith.constant dense<0.000000e+00> : vector<8x8xf32>
    %100 = tpu.matmul %98, %99, %cst_44 {dimension_numbers = #tpu.dot_dimension_numbers<[1], [0], [0], [1], [0, 0, 1, 1], [], []>} : vector<8x8xbf16>, vector<8x8xbf16>, vector<8x8xf32> -> vector<8x8xf32>
    %101 = arith.truncf %100 : vector<8x8xf32> to vector<8x8xbf16>
    %c0_45 = arith.constant 0 : index
    %c16_46 = arith.constant 16 : index
    %102 = vector.load %arg15[%c0_45, %c16_46] : memref<8x32xbf16, #tpu.memory_space<vmem>>, vector<8x8xbf16>
    tpu.vector_store %arg15[%c0_45, %c16_46], %101 {strides = array<i32>} : memref<8x32xbf16, #tpu.memory_space<vmem>>, vector<8x8xbf16>,
    %103 = vector.extract_strided_slice %35 {offsets = [0, 24], sizes = [8, 8], strides = [1, 1]} : vector<8x32xf32> to vector<8x8xf32>
    %104 = arith.truncf %103 : vector<8x8xf32> to vector<8x8xbf16>
    %c0_47 = arith.constant 0 : index
    %c24 = arith.constant 24 : index
    %105 = vector.load %arg13[%c0_47, %c24] : memref<8x32xbf16, #tpu.memory_space<vmem>>, vector<8x8xbf16>
    %cst_48 = arith.constant dense<0.000000e+00> : vector<8x8xf32>
    %106 = tpu.matmul %104, %105, %cst_48 {dimension_numbers = #tpu.dot_dimension_numbers<[1], [1], [0], [0], [0, 0, 1, 0], [], []>} : vector<8x8xbf16>, vector<8x8xbf16>, vector<8x8xf32> -> vector<8x8xf32>
    %107 = vector.broadcast %39 : vector<1x8xf32> to vector<8x8xf32>
    %108 = arith.addf %106, %107 : vector<8x8xf32>
    %cst_49 = arith.constant dense<0xFF800000> : vector<8xf32>
    %109 = vector.multi_reduction <maximumf>, %108, %cst_49 [1] : vector<8x8xf32> to vector<8xf32>
    %110 = vector.shape_cast %109 : vector<8xf32> to vector<8x1xf32>
    %111 = vector.broadcast %110 : vector<8x1xf32> to vector<8x8xf32>
    %112 = arith.subf %108, %111 : vector<8x8xf32>
    %113 = math.exp %112 : vector<8x8xf32>
    %cst_50 = arith.constant dense<0.000000e+00> : vector<8xf32>
    %114 = vector.multi_reduction <add>, %113, %cst_50 [1] : vector<8x8xf32> to vector<8xf32>
    %115 = vector.shape_cast %114 : vector<8xf32> to vector<8x1xf32>
    %116 = tpu.reciprocal %115 {approx = true} : vector<8x1xf32> -> vector<8x1xf32>
    %117 = vector.broadcast %116 : vector<8x1xf32> to vector<8x8xf32>
    %118 = arith.mulf %113, %117 : vector<8x8xf32>
    %119 = arith.truncf %118 : vector<8x8xf32> to vector<8x8xbf16>
    %c0_51 = arith.constant 0 : index
    %c24_52 = arith.constant 24 : index
    %120 = vector.load %arg14[%c0_51, %c24_52] : memref<8x32xbf16, #tpu.memory_space<vmem>>, vector<8x8xbf16>
    %cst_53 = arith.constant dense<0.000000e+00> : vector<8x8xf32>
    %121 = tpu.matmul %119, %120, %cst_53 {dimension_numbers = #tpu.dot_dimension_numbers<[1], [0], [0], [1], [0, 0, 1, 1], [], []>} : vector<8x8xbf16>, vector<8x8xbf16>, vector<8x8xf32> -> vector<8x8xf32>
    %122 = arith.truncf %121 : vector<8x8xf32> to vector<8x8xbf16>
    %c0_54 = arith.constant 0 : index
    %c24_55 = arith.constant 24 : index
    %123 = vector.load %arg15[%c0_54, %c24_55] : memref<8x32xbf16, #tpu.memory_space<vmem>>, vector<8x8xbf16>
    tpu.vector_store %arg15[%c0_54, %c24_55], %122 {strides = array<i32>} : memref<8x32xbf16, #tpu.memory_space<vmem>>, vector<8x8xbf16>,
    %c0_56 = arith.constant 0 : index
    %c0_57 = arith.constant 0 : index
    %124 = vector.load %arg15[%c0_56, %c0_57] : memref<8x32xbf16, #tpu.memory_space<vmem>>, vector<8x32xbf16>
    %c0_58 = arith.constant 0 : index
    %c0_59 = arith.constant 0 : index
    %125 = vector.load %arg10[%c0_58, %c0_59] : memref<32x32xbf16, #tpu.memory_space<vmem>>, vector<32x32xbf16>
    %cst_60 = arith.constant dense<0.000000e+00> : vector<8x32xf32>
    %126 = tpu.matmul %124, %125, %cst_60 {dimension_numbers = #tpu.dot_dimension_numbers<[1], [0], [0], [1], [0, 0, 1, 1], [], []>} : vector<8x32xbf16>, vector<32x32xbf16>, vector<8x32xf32> -> vector<8x32xf32>
    %c0_61 = arith.constant 0 : index
    %c0_62 = arith.constant 0 : index
    %127 = vector.load %arg11[%c0_61, %c0_62] : memref<1x32xf32, #tpu.memory_space<vmem>>, vector<1x32xf32>
    %128 = vector.broadcast %127 : vector<1x32xf32> to vector<8x32xf32>
    %129 = arith.addf %126, %128 : vector<8x32xf32>
    %130 = arith.addf %129, %7 : vector<8x32xf32>
    %c0_63 = arith.constant 0 : index
    %c0_64 = arith.constant 0 : index
    %c0_65 = arith.constant 0 : index
    %131 = vector.load %arg12[%c0_63, %c0_64, %c0_65] : memref<1x8x32xf32, #tpu.memory_space<vmem>>, vector<1x8x32xf32>
    %132 = vector.shape_cast %131 : vector<1x8x32xf32> to vector<8x32xf32>
    %133 = vector.shape_cast %130 : vector<8x32xf32> to vector<1x8x32xf32>
    tpu.vector_store %arg12[%c0_63, %c0_64, %c0_65], %133 {strides = array<i32>} : memref<1x8x32xf32, #tpu.memory_space<vmem>>, vector<1x8x32xf32>,
    return
  }
  func.func @transform_0(%arg0: i32, %arg1: i32) -> (i32, i32, i32) {
    %c0_i32 = arith.constant 0 : i32
    %c0_i32_0 = arith.constant 0 : i32
    %c0_i32_1 = arith.constant 0 : i32
    return %arg0, %c0_i32, %c0_i32_0 : i32, i32, i32
  }
  func.func @transform_1(%arg0: i32, %arg1: i32) -> (i32, i32, i32) {
    %c0_i32 = arith.constant 0 : i32
    %c0_i32_0 = arith.constant 0 : i32
    %c0_i32_1 = arith.constant 0 : i32
    return %arg0, %c0_i32, %c0_i32_0 : i32, i32, i32
  }
  func.func @transform_2(%arg0: i32, %arg1: i32) -> (i32, i32) {
    %c0_i32 = arith.constant 0 : i32
    %c0_i32_0 = arith.constant 0 : i32
    %c0_i32_1 = arith.constant 0 : i32
    return %c0_i32, %c0_i32_0 : i32, i32
  }
  func.func @transform_3(%arg0: i32, %arg1: i32) -> (i32, i32) {
    %c0_i32 = arith.constant 0 : i32
    %c0_i32_0 = arith.constant 0 : i32
    %c0_i32_1 = arith.constant 0 : i32
    return %c0_i32, %c0_i32_0 : i32, i32
  }
  func.func @transform_4(%arg0: i32, %arg1: i32) -> (i32, i32) {
    %c0_i32 = arith.constant 0 : i32
    %c0_i32_0 = arith.constant 0 : i32
    %c0_i32_1 = arith.constant 0 : i32
    return %c0_i32, %c0_i32_0 : i32, i32
  }
  func.func @transform_5(%arg0: i32, %arg1: i32) -> (i32, i32) {
    %c0_i32 = arith.constant 0 : i32
    %c0_i32_0 = arith.constant 0 : i32
    %c0_i32_1 = arith.constant 0 : i32
    return %c0_i32, %c0_i32_0 : i32, i32
  }
  func.func @transform_6(%arg0: i32, %arg1: i32) -> (i32, i32) {
    %c0_i32 = arith.constant 0 : i32
    %c0_i32_0 = arith.constant 0 : i32
    %c0_i32_1 = arith.constant 0 : i32
    return %c0_i32, %c0_i32_0 : i32, i32
  }
  func.func @transform_7(%arg0: i32, %arg1: i32) -> (i32, i32) {
    %c0_i32 = arith.constant 0 : i32
    %c0_i32_0 = arith.constant 0 : i32
    %c0_i32_1 = arith.constant 0 : i32
    return %c0_i32, %c0_i32_0 : i32, i32
  }
  func.func @transform_8(%arg0: i32, %arg1: i32) -> (i32, i32) {
    %c0_i32 = arith.constant 0 : i32
    %c0_i32_0 = arith.constant 0 : i32
    %c0_i32_1 = arith.constant 0 : i32
    return %c0_i32, %c0_i32_0 : i32, i32
  }
  func.func @transform_9(%arg0: i32, %arg1: i32) -> (i32, i32) {
    %c0_i32 = arith.constant 0 : i32
    %c0_i32_0 = arith.constant 0 : i32
    %c0_i32_1 = arith.constant 0 : i32
    return %c0_i32, %c0_i32_0 : i32, i32
  }
  func.func @transform_10(%arg0: i32, %arg1: i32) -> (i32, i32, i32) {
    %c0_i32 = arith.constant 0 : i32
    %c0_i32_0 = arith.constant 0 : i32
    return %arg0, %arg1, %c0_i32 : i32, i32, i32
  }
}

module attributes {stable_mosaic.version = 11 : i64} {
  func.func @_ffn_kernel(%arg0: i32, %arg1: memref<16x32xf32, #tpu.memory_space<vmem>>, %arg2: memref<1x32xf32, #tpu.memory_space<vmem>>, %arg3: memref<1x32xf32, #tpu.memory_space<vmem>>, %arg4: memref<32x64xbf16, #tpu.memory_space<vmem>>, %arg5: memref<1x64xf32, #tpu.memory_space<vmem>>, %arg6: memref<64x32xbf16, #tpu.memory_space<vmem>>, %arg7: memref<1x32xf32, #tpu.memory_space<vmem>>, %arg8: memref<16x32xf32, #tpu.memory_space<vmem>>) attributes {dimension_semantics = [#tpu.dimension_semantics<parallel>], iteration_bounds = array<i64: 1>, scalar_prefetch = 0 : i64, scratch_operands = 0 : i64, tpu.core_type = #tpu.core_type<tc>, window_params = [{transform_indices = @transform_0, window_bounds = array<i64: 16, 32>}, {pipeline_mode = #tpu.pipeline_mode<synchronous>, transform_indices = @transform_1, window_bounds = array<i64: 1, 32>}, {pipeline_mode = #tpu.pipeline_mode<synchronous>, transform_indices = @transform_2, window_bounds = array<i64: 1, 32>}, {pipeline_mode = #tpu.pipeline_mode<synchronous>, transform_indices = @transform_3, window_bounds = array<i64: 32, 64>}, {pipeline_mode = #tpu.pipeline_mode<synchronous>, transform_indices = @transform_4, window_bounds = array<i64: 1, 64>}, {pipeline_mode = #tpu.pipeline_mode<synchronous>, transform_indices = @transform_5, window_bounds = array<i64: 64, 32>}, {pipeline_mode = #tpu.pipeline_mode<synchronous>, transform_indices = @transform_6, window_bounds = array<i64: 1, 32>}, {transform_indices = @transform_7, window_bounds = array<i64: 16, 32>}]} {
    %c0 = arith.constant 0 : index
    %c0_0 = arith.constant 0 : index
    %0 = vector.load %arg1[%c0, %c0_0] : memref<16x32xf32, #tpu.memory_space<vmem>>, vector<16x32xf32>
    %cst = arith.constant dense<0.000000e+00> : vector<16xf32>
    %1 = vector.multi_reduction <add>, %0, %cst [1] : vector<16x32xf32> to vector<16xf32>
    %2 = vector.shape_cast %1 : vector<16xf32> to vector<16x1xf32>
    %cst_1 = arith.constant 3.200000e+01 : f32
    %3 = vector.broadcast %cst_1 : f32 to vector<16x1xf32>
    %4 = arith.divf %2, %3 : vector<16x1xf32>
    %5 = vector.broadcast %4 : vector<16x1xf32> to vector<16x32xf32>
    %6 = arith.subf %0, %5 : vector<16x32xf32>
    %7 = arith.mulf %6, %6 : vector<16x32xf32>
    %cst_2 = arith.constant dense<0.000000e+00> : vector<16xf32>
    %8 = vector.multi_reduction <add>, %7, %cst_2 [1] : vector<16x32xf32> to vector<16xf32>
    %9 = vector.shape_cast %8 : vector<16xf32> to vector<16x1xf32>
    %cst_3 = arith.constant 3.200000e+01 : f32
    %10 = vector.broadcast %cst_3 : f32 to vector<16x1xf32>
    %11 = arith.divf %9, %10 : vector<16x1xf32>
    %cst_4 = arith.constant 9.99999974E-6 : f32
    %12 = vector.broadcast %cst_4 : f32 to vector<16x1xf32>
    %13 = arith.addf %11, %12 : vector<16x1xf32>
    %14 = math.rsqrt %13 : vector<16x1xf32>
    %15 = vector.broadcast %14 : vector<16x1xf32> to vector<16x32xf32>
    %16 = arith.mulf %6, %15 : vector<16x32xf32>
    %c0_5 = arith.constant 0 : index
    %c0_6 = arith.constant 0 : index
    %17 = vector.load %arg2[%c0_5, %c0_6] : memref<1x32xf32, #tpu.memory_space<vmem>>, vector<1x32xf32>
    %18 = vector.broadcast %17 : vector<1x32xf32> to vector<16x32xf32>
    %19 = arith.mulf %16, %18 : vector<16x32xf32>
    %c0_7 = arith.constant 0 : index
    %c0_8 = arith.constant 0 : index
    %20 = vector.load %arg3[%c0_7, %c0_8] : memref<1x32xf32, #tpu.memory_space<vmem>>, vector<1x32xf32>
    %21 = vector.broadcast %20 : vector<1x32xf32> to vector<16x32xf32>
    %22 = arith.addf %19, %21 : vector<16x32xf32>
    %23 = arith.truncf %22 : vector<16x32xf32> to vector<16x32xbf16>
    %c0_9 = arith.constant 0 : index
    %c0_10 = arith.constant 0 : index
    %24 = vector.load %arg4[%c0_9, %c0_10] : memref<32x64xbf16, #tpu.memory_space<vmem>>, vector<32x64xbf16>
    %cst_11 = arith.constant dense<0.000000e+00> : vector<16x64xf32>
    %25 = tpu.matmul %23, %24, %cst_11 {dimension_numbers = #tpu.dot_dimension_numbers<[1], [0], [0], [1], [0, 0, 1, 1], [], []>} : vector<16x32xbf16>, vector<32x64xbf16>, vector<16x64xf32> -> vector<16x64xf32>
    %c0_12 = arith.constant 0 : index
    %c0_13 = arith.constant 0 : index
    %26 = vector.load %arg5[%c0_12, %c0_13] : memref<1x64xf32, #tpu.memory_space<vmem>>, vector<1x64xf32>
    %27 = vector.broadcast %26 : vector<1x64xf32> to vector<16x64xf32>
    %28 = arith.addf %25, %27 : vector<16x64xf32>
    %cst_14 = arith.constant 0.000000e+00 : f32
    %29 = vector.broadcast %cst_14 : f32 to vector<16x64xf32>
    %30 = arith.maximumf %28, %29 : vector<16x64xf32>
    %31 = arith.truncf %30 : vector<16x64xf32> to vector<16x64xbf16>
    %c0_15 = arith.constant 0 : index
    %c0_16 = arith.constant 0 : index
    %32 = vector.load %arg6[%c0_15, %c0_16] : memref<64x32xbf16, #tpu.memory_space<vmem>>, vector<64x32xbf16>
    %cst_17 = arith.constant dense<0.000000e+00> : vector<16x32xf32>
    %33 = tpu.matmul %31, %32, %cst_17 {dimension_numbers = #tpu.dot_dimension_numbers<[1], [0], [0], [1], [0, 0, 1, 1], [], []>} : vector<16x64xbf16>, vector<64x32xbf16>, vector<16x32xf32> -> vector<16x32xf32>
    %34 = arith.addf %0, %33 : vector<16x32xf32>
    %c0_18 = arith.constant 0 : index
    %c0_19 = arith.constant 0 : index
    %35 = vector.load %arg7[%c0_18, %c0_19] : memref<1x32xf32, #tpu.memory_space<vmem>>, vector<1x32xf32>
    %36 = vector.broadcast %35 : vector<1x32xf32> to vector<16x32xf32>
    %37 = arith.addf %34, %36 : vector<16x32xf32>
    %c0_20 = arith.constant 0 : index
    %c0_21 = arith.constant 0 : index
    %38 = vector.load %arg8[%c0_20, %c0_21] : memref<16x32xf32, #tpu.memory_space<vmem>>, vector<16x32xf32>
    tpu.vector_store %arg8[%c0_20, %c0_21], %37 {strides = array<i32>} : memref<16x32xf32, #tpu.memory_space<vmem>>, vector<16x32xf32>,
    return
  }
  func.func @transform_0(%arg0: i32) -> (i32, i32) {
    %c0_i32 = arith.constant 0 : i32
    %c0_i32_0 = arith.constant 0 : i32
    return %arg0, %c0_i32 : i32, i32
  }
  func.func @transform_1(%arg0: i32) -> (i32, i32) {
    %c0_i32 = arith.constant 0 : i32
    %c0_i32_0 = arith.constant 0 : i32
    %c0_i32_1 = arith.constant 0 : i32
    return %c0_i32, %c0_i32_0 : i32, i32
  }
  func.func @transform_2(%arg0: i32) -> (i32, i32) {
    %c0_i32 = arith.constant 0 : i32
    %c0_i32_0 = arith.constant 0 : i32
    %c0_i32_1 = arith.constant 0 : i32
    return %c0_i32, %c0_i32_0 : i32, i32
  }
  func.func @transform_3(%arg0: i32) -> (i32, i32) {
    %c0_i32 = arith.constant 0 : i32
    %c0_i32_0 = arith.constant 0 : i32
    %c0_i32_1 = arith.constant 0 : i32
    return %c0_i32, %c0_i32_0 : i32, i32
  }
  func.func @transform_4(%arg0: i32) -> (i32, i32) {
    %c0_i32 = arith.constant 0 : i32
    %c0_i32_0 = arith.constant 0 : i32
    %c0_i32_1 = arith.constant 0 : i32
    return %c0_i32, %c0_i32_0 : i32, i32
  }
  func.func @transform_5(%arg0: i32) -> (i32, i32) {
    %c0_i32 = arith.constant 0 : i32
    %c0_i32_0 = arith.constant 0 : i32
    %c0_i32_1 = arith.constant 0 : i32
    return %c0_i32, %c0_i32_0 : i32, i32
  }
  func.func @transform_6(%arg0: i32) -> (i32, i32) {
    %c0_i32 = arith.constant 0 : i32
    %c0_i32_0 = arith.constant 0 : i32
    %c0_i32_1 = arith.constant 0 : i32
    return %c0_i32, %c0_i32_0 : i32, i32
  }
  func.func @transform_7(%arg0: i32) -> (i32, i32) {
    %c0_i32 = arith.constant 0 : i32
    %c0_i32_0 = arith.constant 0 : i32
    return %arg0, %c0_i32 : i32, i32
  }
}

module attributes {stable_mosaic.version = 11 : i64} {
  func.func @_layernorm_kernel(%arg0: i32, %arg1: memref<16x32xf32, #tpu.memory_space<vmem>>, %arg2: memref<1x32xf32, #tpu.memory_space<vmem>>, %arg3: memref<1x32xf32, #tpu.memory_space<vmem>>, %arg4: memref<16x32xf32, #tpu.memory_space<vmem>>) attributes {dimension_semantics = [#tpu.dimension_semantics<parallel>], iteration_bounds = array<i64: 1>, scalar_prefetch = 0 : i64, scratch_operands = 0 : i64, tpu.core_type = #tpu.core_type<tc>, window_params = [{transform_indices = @transform_0, window_bounds = array<i64: 16, 32>}, {pipeline_mode = #tpu.pipeline_mode<synchronous>, transform_indices = @transform_1, window_bounds = array<i64: 1, 32>}, {pipeline_mode = #tpu.pipeline_mode<synchronous>, transform_indices = @transform_2, window_bounds = array<i64: 1, 32>}, {transform_indices = @transform_3, window_bounds = array<i64: 16, 32>}]} {
    %c0 = arith.constant 0 : index
    %c0_0 = arith.constant 0 : index
    %0 = vector.load %arg1[%c0, %c0_0] : memref<16x32xf32, #tpu.memory_space<vmem>>, vector<16x32xf32>
    %cst = arith.constant dense<0.000000e+00> : vector<16xf32>
    %1 = vector.multi_reduction <add>, %0, %cst [1] : vector<16x32xf32> to vector<16xf32>
    %2 = vector.shape_cast %1 : vector<16xf32> to vector<16x1xf32>
    %cst_1 = arith.constant 3.200000e+01 : f32
    %3 = vector.broadcast %cst_1 : f32 to vector<16x1xf32>
    %4 = arith.divf %2, %3 : vector<16x1xf32>
    %5 = vector.broadcast %4 : vector<16x1xf32> to vector<16x32xf32>
    %6 = arith.subf %0, %5 : vector<16x32xf32>
    %7 = arith.mulf %6, %6 : vector<16x32xf32>
    %cst_2 = arith.constant dense<0.000000e+00> : vector<16xf32>
    %8 = vector.multi_reduction <add>, %7, %cst_2 [1] : vector<16x32xf32> to vector<16xf32>
    %9 = vector.shape_cast %8 : vector<16xf32> to vector<16x1xf32>
    %cst_3 = arith.constant 3.200000e+01 : f32
    %10 = vector.broadcast %cst_3 : f32 to vector<16x1xf32>
    %11 = arith.divf %9, %10 : vector<16x1xf32>
    %cst_4 = arith.constant 9.99999974E-6 : f32
    %12 = vector.broadcast %cst_4 : f32 to vector<16x1xf32>
    %13 = arith.addf %11, %12 : vector<16x1xf32>
    %14 = math.rsqrt %13 : vector<16x1xf32>
    %15 = vector.broadcast %14 : vector<16x1xf32> to vector<16x32xf32>
    %16 = arith.mulf %6, %15 : vector<16x32xf32>
    %c0_5 = arith.constant 0 : index
    %c0_6 = arith.constant 0 : index
    %17 = vector.load %arg2[%c0_5, %c0_6] : memref<1x32xf32, #tpu.memory_space<vmem>>, vector<1x32xf32>
    %18 = vector.broadcast %17 : vector<1x32xf32> to vector<16x32xf32>
    %19 = arith.mulf %16, %18 : vector<16x32xf32>
    %c0_7 = arith.constant 0 : index
    %c0_8 = arith.constant 0 : index
    %20 = vector.load %arg3[%c0_7, %c0_8] : memref<1x32xf32, #tpu.memory_space<vmem>>, vector<1x32xf32>
    %21 = vector.broadcast %20 : vector<1x32xf32> to vector<16x32xf32>
    %22 = arith.addf %19, %21 : vector<16x32xf32>
    %c0_9 = arith.constant 0 : index
    %c0_10 = arith.constant 0 : index
    %23 = vector.load %arg4[%c0_9, %c0_10] : memref<16x32xf32, #tpu.memory_space<vmem>>, vector<16x32xf32>
    tpu.vector_store %arg4[%c0_9, %c0_10], %22 {strides = array<i32>} : memref<16x32xf32, #tpu.memory_space<vmem>>, vector<16x32xf32>,
    return
  }
  func.func @transform_0(%arg0: i32) -> (i32, i32) {
    %c0_i32 = arith.constant 0 : i32
    %c0_i32_0 = arith.constant 0 : i32
    return %arg0, %c0_i32 : i32, i32
  }
  func.func @transform_1(%arg0: i32) -> (i32, i32) {
    %c0_i32 = arith.constant 0 : i32
    %c0_i32_0 = arith.constant 0 : i32
    %c0_i32_1 = arith.constant 0 : i32
    return %c0_i32, %c0_i32_0 : i32, i32
  }
  func.func @transform_2(%arg0: i32) -> (i32, i32) {
    %c0_i32 = arith.constant 0 : i32
    %c0_i32_0 = arith.constant 0 : i32
    %c0_i32_1 = arith.constant 0 : i32
    return %c0_i32, %c0_i32_0 : i32, i32
  }
  func.func @transform_3(%arg0: i32) -> (i32, i32) {
    %c0_i32 = arith.constant 0 : i32
    %c0_i32_0 = arith.constant 0 : i32
    return %arg0, %c0_i32 : i32, i32
  }
}

</mosaic_0001>

<bundles_post_ra>
// kernel: tpu_custom_call.1
= control target key start
LH: loop header
LB: loop body
LE: loop exit
PB: predicated region body
PF: predicated region fallthrough
CT: control target
= control target key end

     0   :  { %6 = vsyncpa [#allocation3], 0  ;;  %s124_s0 = inlined_call_operand.hbm [shape: f32[8,128], index: 0, kind: input, shape index: {}]   ;;  %s125_s1 = inlined_call_operand.hbm [shape: f32[8,128], index: 1, kind: output, shape index: {}]  }
   0x1   :  { %7 = vsyncpa [#allocation4], 0  ;;  %s88_s6 = smov [#allocation2]   ;;  %s40_s10 = scalar_lea.hbm %s124_s0, 128 }
   0x2   :  { %s14_s7 = sshll.u32 %s88_s6, 4  ;;  %p41_p0 = scmp.ne.s32.totalorder %s124_s0, %s40_s10  ;;  %s15_s7 = int_to_ptr.vmem [resolvable:$true] %s14_s7 }
   0x3   :  { %p44_p1 = scmp.lt.u32.totalorder %s40_s10, %s124_s0 }
   0x5   :  { %p46_p2 = pnand %p44_p1, %p41_p0 }
   0x7   :  { %49 = shalt.err (!%p46_p2)
}
   0x8   :  { %s50_s15 = scalar_lea.vmem %s15_s7, 128  ;;  %p55_p4 = scmp.lt.s32.totalorder %s15_s7, %s15_s7 }
   0x9   :  { %p51_p3 = scmp.ne.s32.totalorder %s15_s7, %s50_s15  ;;  %p56_p5 = scmp.lt.s32.totalorder %s50_s15, %s50_s15 }
   0xb   :  { %p57_p6 = por %p56_p5, %p55_p4 }
   0xd   :  { %p58_p7 = pnand %p57_p6, %p51_p3 }
   0xf   :  { %61 = shalt.err (!%p58_p7)
}
  0x10   :  { %17 = dma.hbm_to_vmem [thread:$0]  %s124_s0, 128, %s15_s7, [#allocation3]  }
  0x11   :  { %84 = dma.done.wait [#allocation3], 128  }
  0x12   :  { %85 = vsyncadd [#allocation3], 4294967168  ;;  %s89_s18 = smov [#allocation5]   ;;  %v21_v0 = vld [vmem:[#allocation2] sm:$0xff] }
  0x13   :  { %s29_s19 = sshll.u32 %s89_s18, 4  ;;  %22 = vst [vmem:[#allocation5] sm:$0xff] %v21_v0  ;;  %s30_s19 = int_to_ptr.vmem [resolvable:$true] %s29_s19 }
  0x14   :  { %s62_s20 = scalar_lea.vmem %s30_s19, 128  ;;  %p67_p9 = scmp.lt.s32.totalorder %s30_s19, %s30_s19 }
  0x15   :  { %p63_p8 = scmp.ne.s32.totalorder %s30_s19, %s62_s20  ;;  %p68_p10 = scmp.lt.s32.totalorder %s62_s20, %s62_s20 }
  0x17   :  { %p69_p11 = por %p68_p10, %p67_p9 }
  0x19   :  { %p70_p12 = pnand %p69_p11, %p63_p8 }
  0x1b   :  { %73 = shalt.err (!%p70_p12)
}
  0x1c   :  { %s74_s23 = scalar_lea.hbm %s125_s1, 128 }
  0x1d   :  { %p75_p13 = scmp.ne.s32.totalorder %s125_s1, %s74_s23  ;;  %p78_p0 = scmp.lt.u32.totalorder %s74_s23, %s125_s1 }
  0x1f   :  { %p80_p1 = pnand %p78_p0, %p75_p13 }
  0x21   :  { %83 = shalt.err (!%p80_p1)
}
  0x22   :  { %32 = dma.vmem_to_hbm [thread:$0]  %s30_s19, 128, %s125_s1, [#allocation4]  }
  0x23   :  { %86 = dma.done.wait [#allocation4], 128  }
  0x24   :  { %87 = vsyncadd [#allocation4], 4294967168 }
  0x25   :  { %36 = vsyncpa [#allocation3], 1 }
  0x26   :  { %37 = vsyncpa [#allocation4], 1 }

// kernel: _lambda_.7
= control target key start
LH: loop header
LB: loop body
LE: loop exit
PB: predicated region body
PF: predicated region fallthrough
CT: control target
= control target key end

     0   :  { %vm51_vm0 = vcmask 1044480   ;;  %vm52_vm1 = vcmask 1045504   ;;  %v250_v0 = vmov 0.0   ;;  %v251_v2 = vmov 65535   ;;  %s341_s2 = inlined_call_operand.vmem [shape: bf16[11,16], index: 2, kind: input, shape index: {}]   ;;  %s342_s0 = inlined_call_operand.vmem [shape: f32[16,11], index: 0, kind: input, shape index: {}]   ;;  %s343_s6 = inlined_call_operand.vmem [shape: bf16[16,16], index: 6, kind: input, shape index: {}]   ;;  %s344_s1 = inlined_call_operand.vmem [shape: f32[16,16], index: 1, kind: input, shape index: {}]   ;;  %s345_s3 = inlined_call_operand.vmem [shape: f32[1,16], index: 3, kind: input, shape index: {}]   ;;  %s346_s4 = inlined_call_operand.vmem [shape: f32[1,16], index: 4, kind: input, shape index: {}]   ;;  %s347_s5 = inlined_call_operand.vmem [shape: f32[1,16], index: 5, kind: input, shape index: {}]   ;;  %s348_s7 = inlined_call_operand.vmem [shape: f32[1,16], index: 7, kind: input, shape index: {}]   ;;  %s349_s8 = inlined_call_operand.vmem [shape: f32[16,16], index: 8, kind: output, shape index: {}]  }
   0x1   :  { %229 = vmatprep.subr.bf16.mxu0 %v250_v0  ;;  %v244_v1 = vld [vmem:[%s341_s2] sm:$0x3f]   ;;  %235 = vmatprep.subr.bf16.mxu1 %v250_v0  ;;  %v53_v3 = vsel %vm51_vm0, 4294967295, %v251_v2  ;;  %v31_v5 = vld [vmem:[%s342_s0 + $0x8] sm:$0xff]  ;;  %vm252_vm2 = vmmov 0   ;;  %vm47_vm3 = vcmask 89088  }
   0x2   :  { %v30_v4 = vld [vmem:[%s342_s0] sm:$0xff]  ;;  %v54_v6 = vsel %vm52_vm1, %v53_v3, 0  ;;  %231 = vmatprep.mubr.msk.bf16.mxu0 %vm252_vm2, %v250_v0  ;;  %237 = vmatprep.mubr.msk.bf16.mxu1 %vm252_vm2, %v250_v0  ;;  %v146_v11 = vld [vmem:[%s344_s1 + $0x8] sm:$0xff]  ;;  %vm99_vm4 = vcmask 130048  }
   0x3   :  { %v56_v7 = vand.u32 %v244_v1, %v54_v6  ;;  %v32_v8 = vpack.c.bf16 %v31_v5, %v30_v4  ;;  %v245_v9 = vld [vmem:[%s343_s6] sm:$0xff]  }
   0x4   :  { %v145_v10 = vld [vmem:[%s344_s1] sm:$0xff]  ;;  %236 = vmatpush3.bf16.msra.mxu1 %v245_v9 }
   0x5   :  { %230 = vmatpush3.bf16.msra.mxu0 %v56_v7  ;;  %v147_v12 = vpack.c.bf16 %v146_v11, %v145_v10  ;;  %v217_v13 = vld [vmem:[%s345_s3] ss:$0 sm:$0xff] }
   0x6   :  { %v220_v43 = vld [vmem:[%s346_s4] ss:$0 sm:$0xff] }
   0x7   :  { %238 = vmatmul.mubr.msk.bf16.vlgmr.msra.gmra.mrb[0].mxu1 %vm99_vm4, %v147_v12  ;;  %v221_v45 = vld [vmem:[%s347_s5] ss:$0 sm:$0xff] }
   0x8   :  { %232 = vmatmul.mubr.msk.bf16.vlgmr.msra.gmra.mrb[0].mxu0 %vm47_vm3, %v32_v8  ;;  %v224_v50 = vld [vmem:[%s348_s7] ss:$0 sm:$0xff] }
  0xda   :  { %v193_v32 = vpop.f32.mrb[0].mxu1 }
  0xdb   :  { %v92_v14 = vpop.f32.mrb[0].mxu0  ;;  %v239_v33 = vpop.f32.mrb[1].mxu1 }
  0xdc   :  { %v93_v15 = vadd.f32 %v217_v13, %v92_v14  ;;  %v233_v16 = vpop.f32.mrb[1].mxu0  ;;  %v196_v34 = vpop.f32.mrb[2].mxu1 }
  0xdd   :  { %v95_v17 = vpop.f32.mrb[2].mxu0  ;;  %v240_v35 = vpop.f32.mrb[3].mxu1 }
  0xde   :  { %v96_v18 = vadd.f32 %v217_v13, %v95_v17  ;;  %v234_v19 = vpop.f32.mrb[3].mxu0  ;;  %v100_v20 = vsel %vm99_vm4, %v93_v15, 0.0 }
  0xdf   :  { %101 = vadd.xlane.f32.xlu0 %v100_v20 }
  0xe0   :  { %v103_v21 = vsel %vm99_vm4, %v96_v18, 0.0 }
  0xe3   :  { %104 = vadd.xlane.f32.xlu0 %v103_v21 }
 0x16c   :  { %v102_v22 = vpop.xlane.xlu0 %101 }
 0x16d   :  { %v107_v23 = vmul.f32 0.0625, %v102_v22 }
 0x16f   :  { %v109_v24 = vsub.f32 %v93_v15, %v107_v23 }
 0x170   :  { %v105_v25 = vpop.xlane.xlu0 %104 }
 0x171   :  { %v108_v26 = vmul.f32 0.0625, %v105_v25  ;;  %v111_v27 = vmul.f32 %v109_v24, %v109_v24 }
 0x173   :  { %v110_v28 = vsub.f32 %v96_v18, %v108_v26  ;;  %v113_v29 = vsel %vm99_vm4, %v111_v27, 0.0 }
 0x174   :  { %114 = vadd.xlane.f32.xlu1 %v113_v29 }
 0x175   :  { %v112_v30 = vmul.f32 %v110_v28, %v110_v28 }
 0x177   :  { %v116_v31 = vsel %vm99_vm4, %v112_v30, 0.0 }
 0x178   :  { %117 = vadd.xlane.f32.xlu1 %v116_v31 }
 0x201   :  { %v115_v36 = vpop.xlane.xlu1 %114 }
 0x202   :  { %v119_v37 = vmul.f32 0.0625, %v115_v36 }
 0x204   :  { %v121_v38 = vadd.f32 1e-05, %v119_v37 }
 0x205   :  { %v118_v39 = vpop.xlane.xlu1 %117 }
 0x206   :  { %246 = vrsqrt.f32 %v121_v38  ;;  %v120_v40 = vmul.f32 0.0625, %v118_v39 }
 0x208   :  { %v122_v41 = vadd.f32 1e-05, %v120_v40 }
 0x20a   :  { %248 = vrsqrt.f32 %v122_v41 }
 0x210   :  { %v247_v42 = vpop.eup %246 }
 0x211   :  { %v125_v44 = vmul.f32 %v247_v42, %v109_v24 }
 0x213   :  { %v134_v46 = vmul.f32 %v220_v43, %v125_v44 }
 0x214   :  { %v249_v47 = vpop.eup %248 }
 0x215   :  { %v143_v48 = vadd.f32 %v221_v45, %v134_v46  ;;  %v126_v49 = vmul.f32 %v249_v47, %v110_v28 }
 0x217   :  { %v200_v51 = vadd.f32 %v193_v32, %v143_v48  ;;  %v135_v52 = vmul.f32 %v220_v43, %v126_v49 }
 0x219   :  { %v209_v53 = vadd.f32 %v224_v50, %v200_v51  ;;  %v144_v54 = vadd.f32 %v221_v45, %v135_v52 }
 0x21b   :  { %211 = vst.msk [vmem:[%s349_s8] sm:$0xff] %vm99_vm4, %v209_v53  ;;  %v201_v55 = vadd.f32 %v196_v34, %v144_v54 }
 0x21d   :  { %v210_v56 = vadd.f32 %v224_v50, %v201_v55 }
 0x21f   :  { %212 = vst.msk [vmem:[%s349_s8 + $0x8] sm:$0xff] %vm99_vm4, %v210_v56 }

// kernel: _lambda_.8
= control target key start
LH: loop header
LB: loop body
LE: loop exit
PB: predicated region body
PF: predicated region fallthrough
CT: control target
= control target key end

     0   :  { %vm57_vm0 = vcmask 1042432   ;;  %v388_v2 = vmov 0.0   ;;  %vm389_vm1 = vmmov 0   ;;  %vm53_vm2 = vcmask 48128   ;;  %s543_s0 = inlined_call_operand.vmem [shape: f32[16,32], index: 0, kind: input, shape index: {}]   ;;  %s544_s1 = inlined_call_operand.vmem [shape: f32[16,32], index: 1, kind: input, shape index: {}]   ;;  %s545_s2 = inlined_call_operand.vmem [shape: f32[16,6], index: 2, kind: input, shape index: {}]   ;;  %s546_s3 = inlined_call_operand.vmem [shape: f32[16,59], index: 3, kind: input, shape index: {}]   ;;  %s547_s4 = inlined_call_operand.vmem [shape: f32[16,1], index: 4, kind: input, shape index: {}]   ;;  %s548_s5 = inlined_call_operand.vmem [shape: bf16[6,32], index: 5, kind: input, shape index: {}]   ;;  %s549_s6 = inlined_call_operand.vmem [shape: f32[1,32], index: 6, kind: input, shape index: {}]   ;;  %s550_s7 = inlined_call_operand.vmem [shape: f32[1,32], index: 7, kind: input, shape index: {}]   ;;  %s551_s8 = inlined_call_operand.vmem [shape: f32[1,32], index: 8, kind: input, shape index: {}]   ;;  %s552_s9 = inlined_call_operand.vmem [shape: bf16[59,32], index: 9, kind: input, shape index: {}]   ;;  %s553_s10 = inlined_call_operand.vmem [shape: f32[1,32], index: 10, kind: input, shape index: {}]   ;;  %s554_s11 = inlined_call_operand.hbm [shape: f32[16,32], index: 11, kind: output, shape index: {0}]   ;;  %s555_s12 = inlined_call_operand.vmem [shape: f32[16,32], index: 12, kind: output, shape index: {1}]  }
   0x1   :  { %v45_v0 = vld [vmem:[%s548_s5] sm:$0x7]  ;;  %325 = vmatprep.subr.bf16.mxu0 %v388_v2  ;;  %327 = vmatprep.mubr.msk.bf16.mxu0 %vm389_vm1, %v388_v2  ;;  %v43_v4 = vld [vmem:[%s545_s2 + $0x8] sm:$0xff] }
   0x2   :  { %v42_v1 = vld [vmem:[%s545_s2] sm:$0xff]  ;;  %v59_v3 = vsel %vm57_vm0, %v45_v0, 0  ;;  %331 = vmatprep.subr.bf16.mxu1 %v388_v2  ;;  %339 = vmatprep.mubr.msk.bf16.mxu1 %vm389_vm1, %v388_v2 }
   0x3   :  { %326 = vmatpush3.bf16.msra.mxu0 %v59_v3  ;;  %v44_v5 = vpack.c.bf16 %v43_v4, %v42_v1 }
   0x4   :  { %18 = vsyncpa [#allocation3], 0  ;;  %v352_v6 = vld [vmem:[%s552_s9] sm:$0xff]   ;;  %vm210_vm3 = vcmask 1044480   ;;  %v353_v7 = vld [vmem:[%s552_s9 + $0x8] sm:$0xff]   ;;  %vm211_vm4 = vcmask 1045504  }
   0x5   :  { %332 = vmatpush3.bf16.msra.mxu1 %v352_v6  ;;  %v390_v8 = vmov 65535   ;;  %v354_v10 = vld [vmem:[%s552_s9 + $0x10] sm:$0xff]   ;;  %v355_v11 = vld [vmem:[%s552_s9 + $0x18] sm:$0x3f]   ;;  %v165_v14 = vld [vmem:[%s546_s3] sm:$0xff]  ;;  %vm206_vm5 = vcmask 482304  }
   0x6   :  { %328 = vmatmul.mubr.msk.bf16.vlgmr.msra.gmra.mrb[0].mxu0 %vm53_vm2, %v44_v5  ;;  %333 = vmatprep.subr.bf16.mxu1 %v388_v2  ;;  %v212_v9 = vsel %vm210_vm3, 4294967295, %v390_v8  ;;  %v166_v15 = vld [vmem:[%s546_s3 + $0x8] sm:$0xff]  ;;  %v308_v17 = vld [vmem:[%s549_s6] ss:$0 sm:$0xff]  ;;  %vm102_vm6 = vcmask 261120   ;;  %v391_v27 = vmov 0  }
   0x7   :  { %v213_v12 = vsel %vm211_vm4, %v212_v9, 0  ;;  %v167_v16 = vpack.c.bf16 %v166_v15, %v165_v14  ;;  %v270_v26 = vld [vmem:[%s547_s4] sm:$0xff]  ;;  %350 = vset.pattern.permute.xlu0 %v391_v27  ;;  %351 = vset.pattern.permute.xlu1 %v391_v27  ;;  %v271_v39 = vld [vmem:[%s547_s4 + $0x8] sm:$0xff] }
   0x8   :  { %v215_v13 = vand.u32 %v355_v11, %v213_v12  ;;  %v272_v28 = vsub.f32 1.0, %v270_v26  ;;  %v273_v40 = vsub.f32 1.0, %v271_v39  ;;  %v310_v0 = vld [vmem:[%s550_s7] ss:$0 sm:$0xff]  ;;  %v259_v14 = vld [vmem:[%s543_s0 + $0x8] sm:$0xff] }
   0x9   :  { %334 = vmatpush3.bf16.msra.mxu1 %v353_v7  ;;  %v312_v3 = vld [vmem:[%s553_s10] ss:$0 sm:$0xff]  ;;  %s392_s10 = smov [#allocation2]  }
   0xa   :  { %335 = vmatprep.subr.bf16.mxu1 %v388_v2  ;;  %v258_v5 = vld [vmem:[%s543_s0] sm:$0xff]  ;;  %s293_s2 = sshll.u32 %s392_s10, 4  ;;  %s294_s2 = int_to_ptr.vmem [resolvable:$true] %s293_s2 }
   0xb   :  { %v266_v12 = vld [vmem:[%s544_s1] sm:$0xff]  ;;  %s364_s0 = scalar_lea.vmem %s294_s2, 256  ;;  %p369_p1 = scmp.lt.s32.totalorder %s294_s2, %s294_s2 }
   0xc   :  { %p365_p0 = scmp.ne.s32.totalorder %s294_s2, %s364_s0  ;;  %p370_p2 = scmp.lt.s32.totalorder %s364_s0, %s364_s0 }
   0xd   :  { %336 = vmatpush3.bf16.msra.mxu1 %v354_v10 }
   0xe   :  { %337 = vmatprep.subr.bf16.mxu1 %v388_v2  ;;  %v311_v2 = vld [vmem:[%s551_s8] ss:$0 sm:$0xff]  ;;  %p371_p3 = por %p370_p2, %p369_p1 }
  0x10   :  { %p372_p4 = pnand %p371_p3, %p365_p0 }
  0x11   :  { %338 = vmatpush3.bf16.msra.mxu1 %v215_v13 }
  0x14   :  { %340 = vmatmul.mubr.msk.bf16.vlgmr.msra.gmra.mrb[0].mxu1 %vm206_vm5, %v167_v16 }
  0xd9   :  { %v95_v18 = vpop.f32.mrb[0].mxu0 }
  0xda   :  { %v96_v19 = vadd.f32 %v308_v17, %v95_v18  ;;  %v329_v20 = vpop.f32.mrb[1].mxu0 }
  0xdb   :  { %v98_v21 = vpop.f32.mrb[2].mxu0 }
  0xdc   :  { %v99_v22 = vadd.f32 %v308_v17, %v98_v21  ;;  %v330_v23 = vpop.f32.mrb[3].mxu0  ;;  %v103_v24 = vsel %vm102_vm6, %v96_v19, 0.0  ;;  %v267_v21 = vld [vmem:[%s544_s1 + $0x8] sm:$0xff] }
  0xdd   :  { %104 = vadd.xlane.f32.xlu0 %v103_v24 }
  0xde   :  { %v106_v25 = vsel %vm102_vm6, %v99_v22, 0.0 }
  0xe1   :  { %107 = vadd.xlane.f32.xlu0 %v106_v25 }
  0xe7   :  { %v251_v41 = vpop.f32.mrb[0].mxu1 }
  0xe8   :  { %v341_v42 = vpop.f32.mrb[1].mxu1  ;;  %v252_v8 = vadd.f32 %v312_v3, %v251_v41 }
  0xe9   :  { %v254_v43 = vpop.f32.mrb[2].mxu1 }
  0xea   :  { %v342_v44 = vpop.f32.mrb[3].mxu1  ;;  %v255_v18 = vadd.f32 %v312_v3, %v254_v43 }
  0xf7   :  { %276 = vperm.xlu0 %350, %v272_v28  }
 0x16a   :  { %v105_v29 = vpop.xlane.xlu0 %104 }
 0x16b   :  { %v110_v30 = vmul.f32 0.03125, %v105_v29 }
 0x16d   :  { %v112_v31 = vsub.f32 %v96_v19, %v110_v30 }
 0x16e   :  { %v108_v32 = vpop.xlane.xlu0 %107 }
 0x16f   :  { %v111_v33 = vmul.f32 0.03125, %v108_v32  ;;  %v114_v34 = vmul.f32 %v112_v31, %v112_v31 }
 0x171   :  { %v113_v35 = vsub.f32 %v99_v22, %v111_v33  ;;  %v116_v36 = vsel %vm102_vm6, %v114_v34, 0.0 }
 0x172   :  { %117 = vadd.xlane.f32.xlu1 %v116_v36 }
 0x173   :  { %v115_v37 = vmul.f32 %v113_v35, %v113_v35 }
 0x175   :  { %v119_v38 = vsel %vm102_vm6, %v115_v37, 0.0 }
 0x176   :  { %120 = vadd.xlane.f32.xlu1 %v119_v38  ;;  %v277_v16 = vpop.permute.xlu0 %276 }
 0x187   :  { %281 = vperm.xlu1 %351, %v273_v40  }
 0x1ff   :  { %v118_v45 = vpop.xlane.xlu1 %117 }
 0x200   :  { %v123_v46 = vmul.f32 0.032258064, %v118_v45 }
 0x202   :  { %v125_v47 = vadd.f32 1e-06, %v123_v46 }
 0x203   :  { %v121_v48 = vpop.xlane.xlu1 %120 }
 0x204   :  { %356 = vrsqrt.f32 %v125_v47  ;;  %v124_v49 = vmul.f32 0.032258064, %v121_v48  ;;  %vm129_vm7 = vcmp.eq.f32.partialorder %v125_v47, inf  ;;  %v132_v53 = vand.u32 2147483648, %v125_v47 }
 0x205   :  { %vm131_vm8 = vcmp.eq.f32.partialorder %v125_v47, 0.0 }
 0x206   :  { %v126_v50 = vadd.f32 1e-06, %v124_v49 }
 0x207   :  { %v282_v23 = vpop.permute.xlu1 %281 }
 0x208   :  { %358 = vrsqrt.f32 %v126_v50  ;;  %vm136_vm9 = vcmp.eq.f32.partialorder %v126_v50, inf  ;;  %v139_v59 = vand.u32 2147483648, %v126_v50  ;;  %vm138_vm10 = vcmp.eq.f32.partialorder %v126_v50, 0.0 }
 0x20e   :  { %v357_v51 = vpop.eup %356 }
 0x20f   :  { %v128_v52 = vmul.f32 %v357_v51, %v125_v47 }
 0x211   :  { %v130_v54 = vsel %vm129_vm7, %v125_v47, %v128_v52 }
 0x212   :  { %v133_v55 = vsel %vm131_vm8, %v132_v53, %v130_v54  ;;  %v359_v56 = vpop.eup %358 }
 0x213   :  { %v141_v57 = vadd.f32 1e-06, %v133_v55  ;;  %v135_v58 = vmul.f32 %v359_v56, %v126_v50 }
 0x215   :  { %360 = vrcp.f32 %v141_v57  ;;  %v137_v60 = vsel %vm136_vm9, %v126_v50, %v135_v58 }
 0x216   :  { %v140_v61 = vsel %vm138_vm10, %v139_v59, %v137_v60 }
 0x217   :  { %v142_v62 = vadd.f32 1e-06, %v140_v61 }
 0x219   :  { %362 = vrcp.f32 %v142_v62 }
 0x21f   :  { %v361_v63 = vpop.eup %360 }
 0x220   :  { %v144_v1 = vmul.f32 %v361_v63, %v112_v31 }
 0x222   :  { %v154_v4 = vmul.f32 %v310_v0, %v144_v1 }
 0x223   :  { %v363_v6 = vpop.eup %362 }
 0x224   :  { %v163_v7 = vadd.f32 %v311_v2, %v154_v4  ;;  %v146_v9 = vmul.f32 %v363_v6, %v113_v35 }
 0x226   :  { %v260_v10 = vadd.f32 %v258_v5, %v163_v7  ;;  %v155_v11 = vmul.f32 %v310_v0, %v146_v9 }
 0x228   :  { %v262_v13 = vadd.f32 %v260_v10, %v252_v8  ;;  %v164_v15 = vadd.f32 %v311_v2, %v155_v11 }
 0x22a   :  { %264 = vst.msk [vmem:[#allocation2] sm:$0xff] %vm102_vm6, %v262_v13  ;;  %v268_v17 = vadd.f32 %v266_v12, %v262_v13  ;;  %v261_v19 = vadd.f32 %v259_v14, %v164_v15 }
 0x22c   :  { %v284_v20 = vmul.f32 %v277_v16, %v268_v17  ;;  %v263_v22 = vadd.f32 %v261_v19, %v255_v18 }
 0x22e   :  { %286 = vst.msk [vmem:[%s555_s12] sm:$0xff] %vm102_vm6, %v284_v20  ;;  %265 = vst.msk [vmem:[#allocation2 + $0x8] sm:$0xff] %vm102_vm6, %v263_v22  ;;  %v269_v24 = vadd.f32 %v267_v21, %v263_v22 }
 0x22f   :  { %375 = shalt.err (!%p372_p4)
}
 0x230   :  { %s376_s17 = scalar_lea.hbm %s554_s11, 256 }
 0x231   :  { %p377_p5 = scmp.ne.s32.totalorder %s554_s11, %s376_s17  ;;  %p380_p6 = scmp.lt.u32.totalorder %s376_s17, %s554_s11 }
 0x233   :  { %p382_p7 = pnand %p380_p6, %p377_p5 }
 0x235   :  { %385 = shalt.err (!%p382_p7)
}
 0x236   :  { %s393_s9 = smov 128   ;;  %s394_s6 = smov 8   ;;  %v285_v25 = vmul.f32 %v282_v23, %v269_v24 }
 0x237   :  { %299 = dma.vmem_to_hbm [thread:$0]  %s294_s2, 256, %s554_s11, [#allocation3], %s393_s9, %s393_s9, %s394_s6  }
 0x238   :  { %287 = vst.msk [vmem:[%s555_s12 + $0x8] sm:$0xff] %vm102_vm6, %v285_v25 }
 0x239   :  { %386 = dma.done.wait [#allocation3], 256  }
 0x23a   :  { %387 = vsyncadd [#allocation3], 4294967040 }
 0x23b   :  { %307 = vsyncpa [#allocation3], 1 }

// kernel: _lambda_.10
= control target key start
LH: loop header
LB: loop body
LE: loop exit
PB: predicated region body
PF: predicated region fallthrough
CT: control target
= control target key end

     0   :  { %vm29_vm0 = vcmask 261120   ;;  %v292_v15 = vmov 0.0   ;;  %vm293_vm1 = vmmov 0   ;;  %vm178_vm2 = vcmask 523264   ;;  %s393_s0 = inlined_call_operand.vmem [shape: f32[16,32], index: 0, kind: input, shape index: {}]   ;;  %s394_s3 = inlined_call_operand.vmem [shape: bf16[32,64], index: 3, kind: input, shape index: {}]   ;;  %s395_s5 = inlined_call_operand.vmem [shape: bf16[64,32], index: 5, kind: input, shape index: {}]   ;;  %s396_s1 = inlined_call_operand.vmem [shape: f32[1,32], index: 1, kind: input, shape index: {}]   ;;  %s397_s2 = inlined_call_operand.vmem [shape: f32[1,32], index: 2, kind: input, shape index: {}]   ;;  %s398_s4 = inlined_call_operand.vmem [shape: f32[1,64], index: 4, kind: input, shape index: {}]   ;;  %s399_s6 = inlined_call_operand.vmem [shape: f32[1,32], index: 6, kind: input, shape index: {}]   ;;  %s400_s7 = inlined_call_operand.vmem [shape: f32[16,32], index: 7, kind: output, shape index: {}]  }
   0x1   :  { %v337_v0 = vld [vmem:[%s393_s0] sm:$0xff]  ;;  %v342_v1 = vld [vmem:[%s393_s0 + $0x8] sm:$0xff]  ;;  %260 = vmatprep.subr.bf16.mxu0 %v292_v15  ;;  %268 = vmatprep.subr.bf16.mxu1 %v292_v15  ;;  %v286_v36 = vld [vmem:[%s395_s5 + $0x10] sm:$0xff]  }
   0x2   :  { %v30_v2 = vsel %vm29_vm0, %v337_v0, 0.0  ;;  %v33_v3 = vsel %vm29_vm0, %v342_v1, 0.0  ;;  %v282_v14 = vld [vmem:[%s394_s3] sm:$0xff]   ;;  %v283_v16 = vld [vmem:[%s394_s3 + $0x8] sm:$0xff]   ;;  %264 = vmatprep.mubr.msk.bf16.mxu0 %vm293_vm1, %v292_v15  ;;  %276 = vmatprep.mubr.msk.bf16.mxu1 %vm293_vm1, %v292_v15  ;;  %v287_v37 = vld [vmem:[%s395_s5 + $0x18] sm:$0xff]  }
   0x3   :  { %31 = vadd.xlane.f32.xlu0 %v30_v2  ;;  %261 = vmatpush3.bf16.msra.mxu0 %v282_v14  ;;  %v284_v17 = vld [vmem:[%s395_s5] sm:$0xff]   ;;  %v285_v18 = vld [vmem:[%s395_s5 + $0x8] sm:$0xff]  }
   0x4   :  { %262 = vmatprep.subr.bf16.mxu0 %v292_v15  ;;  %269 = vmatpush3.bf16.msra.mxu1 %v284_v17  ;;  %v240_v27 = vld [vmem:[%s396_s1] ss:$0 sm:$0xff] }
   0x5   :  { %270 = vmatprep.subr.bf16.mxu1 %v292_v15  ;;  %v241_v31 = vld [vmem:[%s397_s2] ss:$0 sm:$0xff] }
   0x6   :  { %v242_v38 = vld [vmem:[%s398_s4] ss:$0 sm:$0xff] }
   0x7   :  { %34 = vadd.xlane.f32.xlu0 %v33_v3  ;;  %263 = vmatpush3.bf16.msra.mxu0 %v283_v16  ;;  %v251_v49 = vld [vmem:[%s399_s6] ss:$0 sm:$0xff] }
   0x8   :  { %271 = vmatpush3.bf16.msra.mxu1 %v285_v18 }
   0x9   :  { %272 = vmatprep.subr.bf16.mxu1 %v292_v15 }
   0xc   :  { %273 = vmatpush3.bf16.msra.mxu1 %v286_v36 }
   0xd   :  { %274 = vmatprep.subr.bf16.mxu1 %v292_v15 }
  0x10   :  { %275 = vmatpush3.bf16.msra.mxu1 %v287_v37 }
  0x90   :  { %v32_v4 = vpop.xlane.xlu0 %31 }
  0x91   :  { %v37_v5 = vmul.f32 0.03125, %v32_v4 }
  0x93   :  { %v39_v6 = vsub.f32 %v337_v0, %v37_v5 }
  0x94   :  { %v35_v7 = vpop.xlane.xlu0 %34 }
  0x95   :  { %v38_v8 = vmul.f32 0.03125, %v35_v7  ;;  %v41_v9 = vmul.f32 %v39_v6, %v39_v6 }
  0x97   :  { %v40_v10 = vsub.f32 %v342_v1, %v38_v8  ;;  %v43_v11 = vsel %vm29_vm0, %v41_v9, 0.0 }
  0x98   :  { %44 = vadd.xlane.f32.xlu1 %v43_v11 }
  0x99   :  { %v42_v12 = vmul.f32 %v40_v10, %v40_v10 }
  0x9b   :  { %v46_v13 = vsel %vm29_vm0, %v42_v12, 0.0 }
  0x9c   :  { %47 = vadd.xlane.f32.xlu1 %v46_v13 }
 0x125   :  { %v45_v19 = vpop.xlane.xlu1 %44 }
 0x126   :  { %v49_v20 = vmul.f32 0.03125, %v45_v19 }
 0x128   :  { %v51_v21 = vadd.f32 1e-05, %v49_v20 }
 0x129   :  { %v48_v22 = vpop.xlane.xlu1 %47 }
 0x12a   :  { %288 = vrsqrt.f32 %v51_v21  ;;  %v50_v23 = vmul.f32 0.03125, %v48_v22 }
 0x12c   :  { %v52_v24 = vadd.f32 1e-05, %v50_v23 }
 0x12e   :  { %290 = vrsqrt.f32 %v52_v24 }
 0x134   :  { %v289_v25 = vpop.eup %288 }
 0x135   :  { %v55_v26 = vmul.f32 %v289_v25, %v39_v6 }
 0x137   :  { %v64_v30 = vmul.f32 %v240_v27, %v55_v26 }
 0x138   :  { %v291_v28 = vpop.eup %290 }
 0x139   :  { %v56_v29 = vmul.f32 %v291_v28, %v40_v10  ;;  %v73_v33 = vadd.f32 %v241_v31, %v64_v30 }
 0x13b   :  { %v65_v32 = vmul.f32 %v240_v27, %v56_v29 }
 0x13d   :  { %v74_v34 = vadd.f32 %v241_v31, %v65_v32 }
 0x13f   :  { %v75_v35 = vpack.c.bf16 %v74_v34, %v73_v33 }
 0x141   :  { %265 = vmatmul.mubr.msk.bf16.vlgmr.msra.gmra.mrb[0].mxu0 %vm29_vm0, %v75_v35 }
 0x214   :  { %v136_v39 = vpop.f32.mrb[0].mxu0 }
 0x215   :  { %v137_v40 = vadd.f32 %v242_v38, %v136_v39  ;;  %v266_v41 = vpop.f32.mrb[1].mxu0 }
 0x216   :  { %v139_v42 = vpop.f32.mrb[2].mxu0 }
 0x217   :  { %v140_v43 = vadd.f32 %v242_v38, %v139_v42  ;;  %v267_v44 = vpop.f32.mrb[3].mxu0  ;;  %v143_v45 = vmax.f32 %v137_v40, 0.0 }
 0x219   :  { %v144_v46 = vmax.f32 %v140_v43, 0.0 }
 0x21b   :  { %v145_v47 = vpack.c.bf16 %v144_v46, %v143_v45 }
 0x21d   :  { %277 = vmatmul.mubr.msk.bf16.vlgmr.msra.gmra.mrb[0].mxu1 %vm178_vm2, %v145_v47 }
 0x2f0   :  { %v216_v48 = vpop.f32.mrb[0].mxu1 }
 0x2f1   :  { %v223_v50 = vadd.f32 %v216_v48, %v337_v0  ;;  %v278_v51 = vpop.f32.mrb[1].mxu1 }
 0x2f2   :  { %v219_v52 = vpop.f32.mrb[2].mxu1 }
 0x2f3   :  { %v232_v53 = vadd.f32 %v251_v49, %v223_v50  ;;  %v224_v54 = vadd.f32 %v219_v52, %v342_v1  ;;  %v279_v55 = vpop.f32.mrb[3].mxu1 }
 0x2f5   :  { %234 = vst.msk [vmem:[%s400_s7] sm:$0xff] %vm29_vm0, %v232_v53  ;;  %v233_v56 = vadd.f32 %v251_v49, %v224_v54 }
 0x2f7   :  { %235 = vst.msk [vmem:[%s400_s7 + $0x8] sm:$0xff] %vm29_vm0, %v233_v56 }

// kernel: _lambda_.13
= control target key start
LH: loop header
LB: loop body
LE: loop exit
PB: predicated region body
PF: predicated region fallthrough
CT: control target
= control target key end

     0   :  { %vm16_vm0 = vcmask 261120   ;;  %s118_s0 = inlined_call_operand.vmem [shape: f32[16,32], index: 0, kind: input, shape index: {}]   ;;  %s119_s1 = inlined_call_operand.vmem [shape: f32[1,32], index: 1, kind: input, shape index: {}]   ;;  %s120_s2 = inlined_call_operand.vmem [shape: f32[1,32], index: 2, kind: input, shape index: {}]   ;;  %s121_s3 = inlined_call_operand.vmem [shape: f32[16,32], index: 3, kind: output, shape index: {}]  }
   0x1   :  { %v14_v0 = vld [vmem:[%s118_s0] sm:$0xff]  ;;  %v15_v1 = vld [vmem:[%s118_s0 + $0x8] sm:$0xff] }
   0x2   :  { %v17_v2 = vsel %vm16_vm0, %v14_v0, 0.0  ;;  %v20_v3 = vsel %vm16_vm0, %v15_v1, 0.0  ;;  %v68_v21 = vld [vmem:[%s119_s1] ss:$0 sm:$0xff] }
   0x3   :  { %18 = vadd.xlane.f32.xlu0 %v17_v2  ;;  %v69_v23 = vld [vmem:[%s120_s2] ss:$0 sm:$0xff] }
   0x7   :  { %21 = vadd.xlane.f32.xlu0 %v20_v3 }
  0x90   :  { %v19_v4 = vpop.xlane.xlu0 %18 }
  0x91   :  { %v24_v5 = vmul.f32 0.03125, %v19_v4 }
  0x93   :  { %v26_v6 = vsub.f32 %v14_v0, %v24_v5 }
  0x94   :  { %v22_v7 = vpop.xlane.xlu0 %21 }
  0x95   :  { %v25_v8 = vmul.f32 0.03125, %v22_v7  ;;  %v28_v9 = vmul.f32 %v26_v6, %v26_v6 }
  0x97   :  { %v27_v10 = vsub.f32 %v15_v1, %v25_v8  ;;  %v30_v11 = vsel %vm16_vm0, %v28_v9, 0.0 }
  0x98   :  { %31 = vadd.xlane.f32.xlu1 %v30_v11 }
  0x99   :  { %v29_v12 = vmul.f32 %v27_v10, %v27_v10 }
  0x9b   :  { %v33_v13 = vsel %vm16_vm0, %v29_v12, 0.0 }
  0x9c   :  { %34 = vadd.xlane.f32.xlu1 %v33_v13 }
 0x125   :  { %v32_v14 = vpop.xlane.xlu1 %31 }
 0x126   :  { %v36_v15 = vmul.f32 0.03125, %v32_v14 }
 0x128   :  { %v38_v16 = vadd.f32 1e-05, %v36_v15 }
 0x129   :  { %v35_v17 = vpop.xlane.xlu1 %34 }
 0x12a   :  { %70 = vrsqrt.f32 %v38_v16  ;;  %v37_v18 = vmul.f32 0.03125, %v35_v17 }
 0x12c   :  { %v39_v19 = vadd.f32 1e-05, %v37_v18 }
 0x12e   :  { %72 = vrsqrt.f32 %v39_v19 }
 0x134   :  { %v71_v20 = vpop.eup %70 }
 0x135   :  { %v42_v22 = vmul.f32 %v71_v20, %v26_v6 }
 0x137   :  { %v51_v24 = vmul.f32 %v68_v21, %v42_v22 }
 0x138   :  { %v73_v25 = vpop.eup %72 }
 0x139   :  { %v60_v26 = vadd.f32 %v69_v23, %v51_v24  ;;  %v43_v27 = vmul.f32 %v73_v25, %v27_v10 }
 0x13b   :  { %62 = vst.msk [vmem:[%s121_s3] sm:$0xff] %vm16_vm0, %v60_v26  ;;  %v52_v28 = vmul.f32 %v68_v21, %v43_v27 }
 0x13d   :  { %v61_v29 = vadd.f32 %v69_v23, %v52_v28 }
 0x13f   :  { %63 = vst.msk [vmem:[%s121_s3 + $0x8] sm:$0xff] %vm16_vm0, %v61_v29 }

// kernel: _lambda_.9
= control target key start
LH: loop header
LB: loop body
LE: loop exit
PB: predicated region body
PF: predicated region fallthrough
CT: control target
= control target key end

     0   :  { %s1554_s13 = smov 0   ;;  %s1556_s14 = smov 0   ;;  %s1719_s0 = inlined_call_operand.vmem [shape: f32[2,8,32], index: 0, kind: input, shape index: {}]   ;;  %s1720_s1 = inlined_call_operand.vmem [shape: f32[2,1,8], index: 1, kind: input, shape index: {}]   ;;  %s1721_s2 = inlined_call_operand.vmem [shape: f32[1,32], index: 2, kind: input, shape index: {}]   ;;  %s1722_s3 = inlined_call_operand.vmem [shape: f32[1,32], index: 3, kind: input, shape index: {}]   ;;  %s1723_s4 = inlined_call_operand.vmem [shape: bf16[32,32], index: 4, kind: input, shape index: {}]   ;;  %s1724_s5 = inlined_call_operand.vmem [shape: f32[1,32], index: 5, kind: input, shape index: {}]   ;;  %s1725_s6 = inlined_call_operand.vmem [shape: bf16[32,64], index: 6, kind: input, shape index: {}]   ;;  %s1726_s7 = inlined_call_operand.vmem [shape: f32[1,64], index: 7, kind: input, shape index: {}]   ;;  %s1727_s8 = inlined_call_operand.vmem [shape: bf16[32,32], index: 8, kind: input, shape index: {}]   ;;  %s1728_s9 = inlined_call_operand.vmem [shape: f32[1,32], index: 9, kind: input, shape index: {}]   ;;  %s1729_s10 = inlined_call_operand.vmem [shape: f32[2,8,32], index: 10, kind: output, shape index: {}]  }
   0x1   :  { %s1558_s15 = smov 0  }
   0x2 LB: > { %s32_s16 = sadd.s32 1, %s1484_s14  ;;  %p1261_p0 = scmp.ge.s32.totalorder %s1488_s15, 1  ;;  %s1488_s15 = sphi %s1558_s15, %s20_s15   ;;  %s1484_s14 = sphi %s1556_s14, %s1731_s14   ;;  %s1480_s13 = sphi %s1554_s13, %s1730_s13  }
   0x3   : > { %p34_p1 = scmp.ge.s32.totalorder %s32_s16, 2  ;;  %p333_p2 = scmp.lt.s32.totalorder %s1488_s15, 3 }
   0x5   : > { %s1733_s16 = smov (%p34_p1, %s32_s16), 0  ;;  %p334_p3 = pnand %p1261_p0, %p333_p2 }
   0x6   : > { %p375_p4 = scmp.lt.s32.totalorder (!%p334_p3), %s1480_s13, 1  ;;  %vm395_vm0 = vcmask (!%p334_p3), 261120   ;;  %v1434_v12 = vld [vmem:[%s1725_s6] sm:$0xff] (!%p334_p3)   ;;  %v1490_v14 = vmov (!%p334_p3), 0.0   ;;  %v1435_v15 = vld [vmem:[%s1725_s6 + $0x8] sm:$0xff] (!%p334_p3)   ;;  %vm1491_vm1 = vmmov (!%p334_p3), 0   ;;  %v609_v63 = vlaneseq (!%p334_p3) }
   0x7   : > { %337 = sbr.rel (%p334_p3) target bundleno = 1790 (0x6fe), region = 60  ;;  %v1436_v13 = vld [vmem:[%s1723_s4] sm:$0xff] (!%p334_p3)   ;;  %1329 = vmatprep.subr.bf16.mxu0 (!%p334_p3), %v1490_v14  ;;  %1337 = vmatprep.subr.bf16.mxu1 (!%p334_p3), %v1490_v14  ;;  %v1437_v16 = vld [vmem:[%s1723_s4 + $0x8] sm:$0xff] (!%p334_p3)   ;;  %vm494_vm2 = vcmask (!%p334_p3), 257024   ;;  %s1492_s22 = smov (!%p334_p3), 120   ;;  %vm614_vm3 = vcmask (!%p334_p3), 64512  }
   0x8   : > { %1330 = vmatpush3.bf16.msra.mxu0 (!%p334_p3), %v1434_v12  ;;  %1338 = vmatpush3.bf16.msra.mxu1 (!%p334_p3), %v1436_v13  ;;  %v1264_v24 = vld [vmem:[%s1721_s2] ss:$0 sm:$0xff] (!%p334_p3)  ;;  %s1493_s23 = smov (!%p334_p3), 112   ;;  %s1494_s24 = smov (!%p334_p3), 104   ;;  %vm677_vm4 = vcmask (!%p334_p3), 1043456   ;;  %vm722_vm5 = vcmask (!%p334_p3), 60416  }
   0x9   : > { %1331 = vmatprep.subr.bf16.mxu0 (!%p334_p3), %v1490_v14  ;;  %1333 = vmatprep.mubr.msk.bf16.mxu0 (!%p334_p3), %vm1491_vm1, %v1490_v14  ;;  %v1265_v26 = vld [vmem:[%s1722_s3] ss:$0 sm:$0xff] (!%p334_p3)  ;;  %s1495_s28 = smov (!%p334_p3), 96   ;;  %s1496_s29 = smov (!%p334_p3), 8   ;;  %vm850_vm6 = vcmask (!%p334_p3), 126016   ;;  %vm977_vm7 = vcmask (!%p334_p3), 191616  }
   0xa   : > { %1339 = vmatprep.subr.bf16.mxu1 (!%p334_p3), %v1490_v14  ;;  %1341 = vmatprep.mubr.msk.bf16.mxu1 (!%p334_p3), %vm1491_vm1, %v1490_v14  ;;  %v1266_v35 = vld [vmem:[%s1726_s7] ss:$0 sm:$0xff] (!%p334_p3)  ;;  %s1497_s19 = smov (!%p334_p3), 16   ;;  %vm1104_vm8 = vcmask (!%p334_p3), 257216  }
   0xb   : > { %v1273_v40 = vld [vmem:[%s1724_s5] ss:$0 sm:$0xff] (!%p334_p3) }
   0xc   : > { %1332 = vmatpush3.bf16.msra.mxu0 (!%p334_p3), %v1435_v15  ;;  %1340 = vmatpush3.bf16.msra.mxu1 (!%p334_p3), %v1437_v16 }
   0xd   : > { %1345 = vmatprep.subr.bf16.mxu0 (!%p334_p3), %v1490_v14  ;;  %1351 = vmatprep.subr.bf16.mxu1 (!%p334_p3), %v1490_v14 }
   0xe   : > { %s1735_s13 = smov (!%p375_p4, %s1480_s13), 1 }
   0xf   : > { %s1262_s17 = sshll.u32 %s1735_s13, 3  ;;  %s381_s27 = scalar_lea.vmem %s1720_s1, %s1735_s13 }
  0x10   : > { %s378_s20 = scalar_lea.vmem %s1719_s0, %s1262_s17  ;;  %s388_s25 = scalar_lea.vmem %s1729_s10, %s1262_s17 }
  0x11   : > { %v1580_v0 = vld [vmem:[%s378_s20] sm:$0xff]  ;;  %s1498_s20 = smov 24  }
  0x12   : > { %v396_v1 = vsel %vm395_vm0, %v1580_v0, 0.0 }
  0x13   : > { %397 = vadd.xlane.f32.xlu0 %v396_v1 }
  0x17   : > { %508 = vadd.xlane.f32.xlu0 %v396_v1  ;;  %v610_v1 = vshrl.u32 %v609_v63, 7 }
  0xa0   : > { %v398_v2 = vpop.xlane.xlu0 %397 }
  0xa1   : > { %v400_v3 = vmul.f32 0.03125, %v398_v2  ;;  %v604_v2 = vld [vmem:[%s381_s27] sm:$0x1] }
  0xa3   : > { %v401_v4 = vsub.f32 %v1580_v0, %v400_v3  ;;  %v605_v3 = vmul.f32 -1e+09, %v604_v2 }
  0xa4   : > { %v509_v5 = vpop.xlane.xlu0 %508 }
  0xa5   : > { %v511_v6 = vmul.f32 0.03125, %v509_v5  ;;  %v402_v7 = vmul.f32 %v401_v4, %v401_v4 }
  0xa7   : > { %v512_v8 = vsub.f32 %v1580_v0, %v511_v6  ;;  %v403_v9 = vsel %vm395_vm0, %v402_v7, 0.0 }
  0xa8   : > { %404 = vadd.xlane.f32.xlu1 %v403_v9 }
  0xa9   : > { %v513_v10 = vmul.f32 %v512_v8, %v512_v8 }
  0xab   : > { %v514_v11 = vsel %vm395_vm0, %v513_v10, 0.0 }
  0xac   : > { %515 = vadd.xlane.f32.xlu1 %v514_v11 }
 0x135   : > { %v405_v17 = vpop.xlane.xlu1 %404 }
 0x136   : > { %v406_v18 = vmul.f32 0.03125, %v405_v17 }
 0x138   : > { %v407_v19 = vadd.f32 1e-05, %v406_v18 }
 0x139   : > { %v516_v20 = vpop.xlane.xlu1 %515 }
 0x13a   : > { %1446 = vrsqrt.f32 %v407_v19  ;;  %v517_v21 = vmul.f32 0.03125, %v516_v20 }
 0x13c   : > { %v518_v22 = vadd.f32 1e-05, %v517_v21 }
 0x13e   : > { %1448 = vrsqrt.f32 %v518_v22 }
 0x144   : > { %v1447_v23 = vpop.eup %1446 }
 0x145   : > { %v409_v25 = vmul.f32 %v1447_v23, %v401_v4  ;;  %v611_v4 = vsub.s32 0, %v610_v1 }
 0x147   : > { %v417_v27 = vmul.f32 %v1264_v24, %v409_v25  ;;  %v612_v5 = vrot.slane %v605_v3, %v611_v4 }
 0x148   : > { %v1449_v28 = vpop.eup %1448 }
 0x149   : > { %v425_v29 = vadd.f32 %v1265_v26, %v417_v27  ;;  %v520_v30 = vmul.f32 %v1449_v28, %v512_v8 }
 0x14b   : > { %v426_v31 = vpack.c.bf16 %v425_v29, %v425_v29  ;;  %v528_v32 = vmul.f32 %v1264_v24, %v520_v30 }
 0x14d   : > { %1334 = vmatmul.mubr.msk.bf16.vlgmr.msra.gmra.mrb[0].mxu0 %vm395_vm0, %v426_v31  ;;  %v536_v33 = vadd.f32 %v1265_v26, %v528_v32 }
 0x14e   : > { %1347 = vmatprep.mubr.msk.bf16.mxu0 %vm1491_vm1, %v1490_v14 }
 0x14f   : > { %v537_v34 = vpack.c.bf16 %v536_v33, %v536_v33 }
 0x151   : > { %1342 = vmatmul.mubr.msk.bf16.vlgmr.msra.gmra.mrb[0].mxu1 %vm395_vm0, %v537_v34 }
 0x152   : > { %1353 = vmatprep.mubr.msk.bf16.mxu1 %vm1491_vm1, %v1490_v14 }
 0x220   : > { %v487_v36 = vpop.f32.mrb[0].mxu0 }
 0x221   : > { %v488_v37 = vadd.f32 %v1266_v35, %v487_v36  ;;  %v1335_v38 = vpop.f32.mrb[1].mxu0 }
 0x222   : > { %v490_v39 = vpop.f32.mrb[2].mxu0 }
 0x223   : > { %v1628_v41 = vpack.c.bf16 %v488_v37, %v488_v37  ;;  %v1336_v42 = vpop.f32.mrb[3].mxu0 }
 0x224   : > { %v598_v43 = vpop.f32.mrb[0].mxu1 }
 0x225   : > { %495 = vst.msk [vmem:[#allocation2] sm:$0xf] %vm494_vm2, %v1628_v41  ;;  %v599_v44 = vadd.f32 %v1273_v40, %v598_v43  ;;  %v1343_v45 = vpop.f32.mrb[1].mxu1 }
 0x226   : > { %v601_v46 = vpop.f32.mrb[2].mxu1 }
 0x227   : > { %v606_v47 = vpack.c.bf16 %v599_v44, %v599_v44  ;;  %v1344_v48 = vpop.f32.mrb[3].mxu1 }
 0x229   : > { %726 = vrot.lane.b32.xlu1 %v606_v47, %s1492_s22 }
 0x22c   : > { %v607_v49 = vld [vmem:[#allocation2] sm:$0xf] }
 0x22d   : > { %v1438_v50 = vld [vmem:[#allocation2] ss:$0 sps:$4 sm:$0xff]   ;;  %v619_v51 = vsel %vm614_vm3, %v607_v49, 0 }
 0x22e   : > { %v1439_v52 = vld [vmem:[#allocation2] ss:$0 sps:$4 sm:$0xff]   ;;  %1346 = vmatpush3.bf16.xpose.msra.mxu0 %v619_v51  ;;  %731 = vrot.lane.b32.xlu0 %v1438_v50, %s1492_s22 }
 0x22f   : > { %858 = vrot.lane.b32.xlu1 %v1439_v52, %s1493_s23  ;;  %1357 = vmatprep.subr.bf16.mxu0 %v1490_v14  ;;  %v1440_v53 = vld [vmem:[#allocation2] ss:$0 sps:$4 sm:$0xff]  }
 0x232   : > { %985 = vrot.lane.b32.xlu0 %v1440_v53, %s1494_s24 }
 0x233   : > { %853 = vrot.lane.b32.xlu1 %v606_v47, %s1493_s23 }
 0x235   : > { %1348 = vmatmul.mubr.msk.bf16.vlgmr.msra.gmra.mrb[4].mxu0 %vm614_vm3, %v606_v47 }
 0x236   : > { %1359 = vmatprep.mubr.msk.bf16.mxu0 %vm1491_vm1, %v1490_v14 }
 0x237   : > { %980 = vrot.lane.b32.xlu1 %v606_v47, %s1494_s24 }
 0x29b   : > { %v727_v54 = vpop.permute.xlu1 %726 }
 0x2a0   : > { %v732_v55 = vpop.permute.xlu0 %731 }
 0x2a1   : > { %v737_v56 = vsel %vm614_vm3, %v732_v55, 0  ;;  %v859_v57 = vpop.permute.xlu1 %858 }
 0x2a2   : > { %1358 = vmatpush3.bf16.xpose.msra.mxu0 %v737_v56  ;;  %v864_v58 = vsel %vm614_vm3, %v859_v57, 0 }
 0x2a3   : > { %1369 = vmatprep.subr.bf16.mxu0 %v1490_v14 }
 0x2a4   : > { %v986_v59 = vpop.permute.xlu0 %985 }
 0x2a5   : > { %v854_v60 = vpop.permute.xlu1 %853  ;;  %v991_v61 = vsel %vm614_vm3, %v986_v59, 0 }
 0x2a9   : > { %1360 = vmatmul.mubr.msk.bf16.vlgmr.msra.gmra.mrb[8].mxu0 %vm614_vm3, %v727_v54  ;;  %v981_v62 = vpop.permute.xlu1 %980 }
 0x2aa   : > { %1370 = vmatpush3.bf16.xpose.msra.mxu0 %v864_v58  ;;  %1371 = vmatprep.mubr.msk.bf16.mxu0 %vm1491_vm1, %v1490_v14 }
 0x2ab   : > { %1381 = vmatprep.subr.bf16.mxu0 %v1490_v14 }
 0x2b1   : > { %1372 = vmatmul.mubr.msk.bf16.vlgmr.msra.gmra.mrb[12].mxu0 %vm614_vm3, %v854_v60 }
 0x2b2   : > { %1382 = vmatpush3.bf16.xpose.msra.mxu0 %v991_v61  ;;  %1383 = vmatprep.mubr.msk.bf16.mxu0 %vm1491_vm1, %v1490_v14 }
 0x2b3   : > { %1393 = vmatprep.subr.bf16.mxu0 %v1490_v14 }
 0x2b9   : > { %1384 = vmatmul.mubr.msk.bf16.vlgmr.msra.gmra.mrb[16].mxu0 %vm614_vm3, %v981_v62 }
 0x2ba   : > { %1397 = vmatprep.mubr.msk.bf16.mxu0 %vm1491_vm1, %v1490_v14 }
 0x308   : > { %v655_v6 = vpop.f32.mrb[4].mxu0 }
 0x309   : > { %v656_v7 = vadd.f32 %v655_v6, %v612_v5  ;;  %v1349_v8 = vpop.f32.mrb[5].mxu0 }
 0x30a   : > { %v658_v9 = vpop.f32.mrb[6].mxu0 }
 0x30b   : > { %v1350_v10 = vpop.f32.mrb[7].mxu0  ;;  %v661_v11 = vsel %vm614_vm3, %v656_v7, -inf }
 0x30c   : > { %662 = vmax.xlane.f32.xlu0 %v661_v11 }
 0x37c   : > { %v773_v12 = vpop.f32.mrb[8].mxu0 }
 0x37d   : > { %v774_v13 = vadd.f32 %v773_v12, %v612_v5  ;;  %v1361_v15 = vpop.f32.mrb[9].mxu0 }
 0x37e   : > { %v776_v16 = vpop.f32.mrb[10].mxu0 }
 0x37f   : > { %v1362_v17 = vpop.f32.mrb[11].mxu0  ;;  %v779_v18 = vsel %vm614_vm3, %v774_v13, -inf }
 0x380   : > { %780 = vmax.xlane.f32.xlu1 %v779_v18 }
 0x384   : > { %v900_v19 = vpop.f32.mrb[12].mxu0 }
 0x385   : > { %v901_v20 = vadd.f32 %v900_v19, %v612_v5  ;;  %v1373_v21 = vpop.f32.mrb[13].mxu0 }
 0x386   : > { %v903_v22 = vpop.f32.mrb[14].mxu0 }
 0x387   : > { %v1374_v23 = vpop.f32.mrb[15].mxu0  ;;  %v906_v24 = vsel %vm614_vm3, %v901_v20, -inf }
 0x388   : > { %907 = vmax.xlane.f32.xlu0 %v906_v24 }
 0x38c   : > { %v1027_v25 = vpop.f32.mrb[16].mxu0 }
 0x38d   : > { %v1028_v26 = vadd.f32 %v1027_v25, %v612_v5  ;;  %v1385_v27 = vpop.f32.mrb[17].mxu0 }
 0x38e   : > { %v1030_v28 = vpop.f32.mrb[18].mxu0  ;;  %v1444_v27 = vld [vmem:[%s1727_s8] sm:$0xff]  }
 0x38f   : > { %v1386_v29 = vpop.f32.mrb[19].mxu0  ;;  %v1033_v30 = vsel %vm614_vm3, %v1028_v26, -inf  ;;  %1394 = vmatpush3.bf16.msra.mxu0 %v1444_v27 }
 0x390   : > { %1034 = vmax.xlane.f32.xlu0 %v1033_v30  ;;  %v1445_v29 = vld [vmem:[%s1727_s8 + $0x8] sm:$0xff]   ;;  %1395 = vmatprep.subr.bf16.mxu0 %v1490_v14 }
 0x393   : > { %1396 = vmatpush3.bf16.msra.mxu0 %v1445_v29 }
 0x399   : > { %v663_v31 = vpop.xlane.xlu0 %662 }
 0x39a   : > { %v664_v32 = vsub.f32 %v656_v7, %v663_v31 }
 0x39c   : > { %v665_v33 = vmul.f32 1.442695, %v664_v32 }
 0x39e   : > { %1450 = vpow2.f32 %v665_v33 }
 0x3a6   : > { %499 = vrot.lane.b32.xlu0 %v1628_v41, %s1495_s28 }
 0x3a8   : > { %v1451_v34 = vpop.eup %1450 }
 0x3a9   : > { %v667_v35 = vsel %vm614_vm3, %v1451_v34, 0.0 }
 0x3aa   : > { %668 = vadd.xlane.f32.xlu1 %v667_v35 }
 0x40d   : > { %v781_v36 = vpop.xlane.xlu1 %780 }
 0x40e   : > { %v782_v37 = vsub.f32 %v774_v13, %v781_v36 }
 0x410   : > { %v783_v38 = vmul.f32 1.442695, %v782_v37 }
 0x412   : > { %1452 = vpow2.f32 %v783_v38 }
 0x415   : > { %v908_v39 = vpop.xlane.xlu0 %907 }
 0x416   : > { %v909_v40 = vsub.f32 %v901_v20, %v908_v39 }
 0x418   : > { %v910_v42 = vmul.f32 1.442695, %v909_v40 }
 0x41a   : > { %1454 = vpow2.f32 %v910_v42 }
 0x41c   : > { %v1453_v43 = vpop.eup %1452 }
 0x41d   : > { %v1035_v44 = vpop.xlane.xlu0 %1034  ;;  %v785_v45 = vsel %vm614_vm3, %v1453_v43, 0.0 }
 0x41e   : > { %v1036_v46 = vsub.f32 %v1028_v26, %v1035_v44  ;;  %786 = vadd.xlane.f32.xlu1 %v785_v45 }
 0x420   : > { %v1037_v47 = vmul.f32 1.442695, %v1036_v46 }
 0x421   : > { %v500_v41 = vpop.permute.xlu0 %499 }
 0x422   : > { %1456 = vpow2.f32 %v1037_v47  ;;  %502 = vst.msk [vmem:[#allocation3] sm:$0xf] %vm494_vm2, %v500_v41 }
 0x424   : > { %v1455_v48 = vpop.eup %1454 }
 0x425   : > { %v912_v49 = vsel %vm614_vm3, %v1455_v48, 0.0 }
 0x426   : > { %913 = vadd.xlane.f32.xlu1 %v912_v49 }
 0x429   : > { %v673_v50 = vld [vmem:[#allocation3] sm:$0xf] }
 0x42a   : > { %v1441_v51 = vld [vmem:[#allocation3] ss:$0 sps:$4 sm:$0xff]   ;;  %v679_v52 = vsel %vm677_vm4, %v673_v50, 0 }
 0x42b   : > { %1352 = vmatpush3.bf16.msra.mxu1 %v679_v52  ;;  %922 = vrot.lane.b32.xlu0 %v1441_v51, %s1493_s23  ;;  %v1442_v55 = vld [vmem:[#allocation3] ss:$0 sps:$4 sm:$0xff]  }
 0x42c   : > { %v1457_v53 = vpop.eup %1456  ;;  %1363 = vmatprep.subr.bf16.mxu1 %v1490_v14  ;;  %v1443_v57 = vld [vmem:[#allocation3] ss:$0 sps:$4 sm:$0xff]  }
 0x42d   : > { %v1039_v54 = vsel %vm614_vm3, %v1457_v53, 0.0 }
 0x42e   : > { %1040 = vadd.xlane.f32.xlu1 %v1039_v54 }
 0x42f   : > { %1049 = vrot.lane.b32.xlu0 %v1442_v55, %s1494_s24 }
 0x437   : > { %v669_v56 = vpop.xlane.xlu1 %668 }
 0x438   : > { %1458 = vrcp.f32 %v669_v56 }
 0x43f   : > { %795 = vrot.lane.b32.xlu1 %v1443_v57, %s1492_s22 }
 0x442   : > { %v1459_v58 = vpop.eup %1458 }
 0x443   : > { %v671_v59 = vmul.f32 %v1459_v58, %v1451_v34 }
 0x445   : > { %v672_v60 = vpack.c.bf16 %v671_v59, %v671_v59 }
 0x447   : > { %1354 = vmatmul.mubr.msk.bf16.vlgmr.msra.gmra.mrb[4].mxu1 %vm614_vm3, %v672_v60 }
 0x448   : > { %1365 = vmatprep.mubr.msk.bf16.mxu1 %vm1491_vm1, %v1490_v14 }
 0x49d   : > { %v923_v5 = vpop.permute.xlu0 %922 }
 0x49e   : > { %v928_v8 = vsel %vm677_vm4, %v923_v5, 0 }
 0x4a1   : > { %v1050_v10 = vpop.permute.xlu0 %1049 }
 0x4a2   : > { %v1055_v13 = vsel %vm677_vm4, %v1050_v10, 0 }
 0x4ab   : > { %v787_v61 = vpop.xlane.xlu1 %786 }
 0x4ac   : > { %1460 = vrcp.f32 %v787_v61 }
 0x4b3   : > { %v914_v62 = vpop.xlane.xlu1 %913 }
 0x4b4   : > { %1462 = vrcp.f32 %v914_v62 }
 0x4b6   : > { %v1461_v63 = vpop.eup %1460 }
 0x4b7   : > { %v789_v2 = vmul.f32 %v1461_v63, %v1453_v43  ;;  %v1294_v43 = vld [vmem:[%s1728_s9] ss:$0 sm:$0xff] }
 0x4b9   : > { %v790_v6 = vpack.c.bf16 %v789_v2, %v789_v2 }
 0x4bb   : > { %v1041_v1 = vpop.xlane.xlu1 %1040 }
 0x4bc   : > { %1464 = vrcp.f32 %v1041_v1 }
 0x4be   : > { %v1463_v7 = vpop.eup %1462 }
 0x4bf   : > { %v796_v3 = vpop.permute.xlu1 %795  ;;  %v916_v9 = vmul.f32 %v1463_v7, %v1455_v48 }
 0x4c0   : > { %v801_v4 = vsel %vm677_vm4, %v796_v3, 0 }
 0x4c1   : > { %1364 = vmatpush3.bf16.msra.mxu1 %v801_v4  ;;  %v917_v11 = vpack.c.bf16 %v916_v9, %v916_v9 }
 0x4c2   : > { %1375 = vmatprep.subr.bf16.mxu1 %v1490_v14 }
 0x4c4   : > { %1366 = vmatmul.mubr.msk.bf16.vlgmr.msra.gmra.mrb[8].mxu1 %vm614_vm3, %v790_v6 }
 0x4c5   : > { %1376 = vmatpush3.bf16.msra.mxu1 %v928_v8  ;;  %1377 = vmatprep.mubr.msk.bf16.mxu1 %vm1491_vm1, %v1490_v14 }
 0x4c6   : > { %1387 = vmatprep.subr.bf16.mxu1 %v1490_v14  ;;  %v1465_v12 = vpop.eup %1464 }
 0x4c7   : > { %v1043_v15 = vmul.f32 %v1465_v12, %v1457_v53 }
 0x4c9   : > { %v1044_v16 = vpack.c.bf16 %v1043_v15, %v1043_v15 }
 0x4cc   : > { %1378 = vmatmul.mubr.msk.bf16.vlgmr.msra.gmra.mrb[12].mxu1 %vm614_vm3, %v917_v11 }
 0x4cd   : > { %1388 = vmatpush3.bf16.msra.mxu1 %v1055_v13  ;;  %1389 = vmatprep.mubr.msk.bf16.mxu1 %vm1491_vm1, %v1490_v14 }
 0x4d4   : > { %1390 = vmatmul.mubr.msk.bf16.vlgmr.msra.gmra.mrb[16].mxu1 %vm614_vm3, %v1044_v16 }
 0x51a   : > { %v715_v17 = vpop.f32.mrb[4].mxu1 }
 0x51b   : > { %v721_v18 = vpack.c.bf16 %v715_v17, %v715_v17  ;;  %v1355_v19 = vpop.f32.mrb[5].mxu1 }
 0x51c   : > { %v718_v20 = vpop.f32.mrb[6].mxu1 }
 0x51d   : > { %723 = vst.msk [vmem:[#allocation4] sm:$0xf] %vm722_vm5, %v721_v18  ;;  %v1356_v21 = vpop.f32.mrb[7].mxu1 }
 0x597   : > { %v837_v22 = vpop.f32.mrb[8].mxu1 }
 0x598   : > { %v1301_v23 = vpack.c.bf16 %v837_v22, %v837_v22  ;;  %v1367_v24 = vpop.f32.mrb[9].mxu1 }
 0x599   : > { %v840_v25 = vpop.f32.mrb[10].mxu1 }
 0x59a   : > { %847 = vrot.lane.b32.xlu0 %v1301_v23, %s1496_s29  ;;  %v1368_v26 = vpop.f32.mrb[11].mxu1 }
 0x59f   : > { %v964_v28 = vpop.f32.mrb[12].mxu1 }
 0x5a0   : > { %v1302_v30 = vpack.c.bf16 %v964_v28, %v964_v28  ;;  %v1379_v31 = vpop.f32.mrb[13].mxu1 }
 0x5a1   : > { %v967_v32 = vpop.f32.mrb[14].mxu1 }
 0x5a2   : > { %974 = vrot.lane.b32.xlu1 %v1302_v30, %s1497_s19  ;;  %v1380_v33 = vpop.f32.mrb[15].mxu1 }
 0x5a7   : > { %v1091_v34 = vpop.f32.mrb[16].mxu1 }
 0x5a8   : > { %v1303_v35 = vpack.c.bf16 %v1091_v34, %v1091_v34  ;;  %v1391_v36 = vpop.f32.mrb[17].mxu1 }
 0x5a9   : > { %v1094_v37 = vpop.f32.mrb[18].mxu1 }
 0x5aa   : > { %1101 = vrot.lane.b32.xlu0 %v1303_v35, %s1498_s20  ;;  %v1392_v38 = vpop.f32.mrb[19].mxu1 }
 0x60c   : > { %v848_v39 = vpop.permute.xlu0 %847 }
 0x60d   : > { %851 = vst.msk [vmem:[#allocation4] sm:$0xf] %vm850_vm6, %v848_v39 }
 0x614   : > { %v975_v40 = vpop.permute.xlu1 %974 }
 0x615   : > { %978 = vst.msk [vmem:[#allocation4] sm:$0xf] %vm977_vm7, %v975_v40 }
 0x61c   : > { %v1102_v14 = vpop.permute.xlu0 %1101 }
 0x61d   : > { %1105 = vst.msk [vmem:[#allocation4] sm:$0xf] %vm1104_vm8, %v1102_v14 }
 0x624   : > { %v1106_v42 = vld [vmem:[#allocation4] sm:$0xf] }
 0x625   : > { %1398 = vmatmul.mubr.msk.bf16.vlgmr.msra.gmra.mrb[20].mxu0 %vm395_vm0, %v1106_v42 }
 0x6f8   : > { %v1167_v44 = vpop.f32.mrb[20].mxu0 }
 0x6f9   : > { %v1168_v45 = vadd.f32 %v1294_v43, %v1167_v44  ;;  %v1399_v46 = vpop.f32.mrb[21].mxu0 }
 0x6fa   : > { %v1170_v47 = vpop.f32.mrb[22].mxu0 }
 0x6fb   : > { %v1173_v41 = vadd.f32 %v1168_v45, %v1580_v0  ;;  %v1400_v48 = vpop.f32.mrb[23].mxu0 }
 0x6fd   : > { %1174 = vst.msk [vmem:[%s388_s25] sm:$0xff] %vm395_vm0, %v1173_v41 }
 0x6fe PF: > { %s20_s15 = sadd.s32 1, %s1488_s15   ;;  %s1730_s13 = smov %s1484_s14 }
 0x6ff   : > { %p17_p5 = scmp.ge.s32.totalorder %s20_s15, 4   ;;  %s1731_s14 = smov %s1733_s16 }
 0x701   :  { %19 = sbr.rel (!%p17_p5) target bundleno = 2 (0x2), region = 98 }

</bundles_post_ra>
